<compile_context>
chip_gen: v5e
topology: v5e:2x2
jax: 0.10.0
libtpu: 0.0.40
codegen_flags: <defaults>
</compile_context>

<pallas_src>
import functools

import jax
import jax.numpy as jnp
from jax.experimental import pallas as pl
from jax.experimental.pallas import tpu as pltpu

# Cast MXU operands to bf16 (f32 accumulation). Flip True on v6e/v7x at realistic channel counts
# (fp32 matmul is emulated multi-pass there); left off here so the strict 1e-4 check passes.
USE_BF16_MXU_OPERANDS = False


def _bilinear_matrix(n_in, n_out):
    """Interpolation matrix for 1-D bilinear resize with align_corners=True."""
    if n_in == 1:
        return jnp.ones((n_out, 1), jnp.float32)
    src = jnp.arange(n_out, dtype=jnp.float32) * (n_in - 1) / (n_out - 1)
    i0 = jnp.clip(jnp.floor(src).astype(jnp.int32), 0, n_in - 2)
    w1 = src - i0.astype(jnp.float32)
    w0 = 1.0 - w1
    m = jnp.zeros((n_out, n_in), jnp.float32)
    rows = jnp.arange(n_out)
    m = m.at[rows, i0].add(w0)
    m = m.at[rows, i0 + 1].add(w1)
    return m


def _conv_bn_relu_kernel(x2_ref, x1_ref, w2_ref, bias_ref, out_ref, xbuf_ref,
                         *, h, w, wp, c2, c1):
    # x2_ref  : (1, C2, H, W)        full-res skip input (raw, unpadded)
    # x1_ref  : (1, C1, H, W)        bilinearly upsampled input (raw, unpadded)
    # w2_ref  : (Cout_p, 9*Cin)      BN-scale-folded conv weights, tap-major columns (dh, dw, ci)
    # bias_ref: (Cout_p, 1)          folded BN bias = beta - mean * scale (zeros on padded rows)
    # out_ref : (1, Cout_p, H*Wp)    conv+BN+ReLU on the Wp-pitched rows (junk cols dropped later)
    # xbuf_ref: (Cin, (H+3)*Wp)      VMEM scratch: zero-padded concat, rows flattened into lanes
    cin = c2 + c1
    cout_p = out_ref.shape[1]
    lw = h * wp

    # Zero the padded buffer every step (cheap VMEM-only pass; keeps the halo correct and is safe
    # under "parallel" megacore grid splitting), then scatter the data rows into the interior.
    # Data pixel (d, c) lives at flat lane (d+1)*Wp + (c+1); everything else is zero padding.
    xbuf_ref[...] = jnp.zeros_like(xbuf_ref)
    for d in range(h):
        off = (d + 1) * wp + 1
        xbuf_ref[0:c2, off:off + w] = x2_ref[0, :, d, :]          # x2 channels first (torch.cat order)
        xbuf_ref[c2:cin, off:off + w] = x1_ref[0, :, d, :]        # then upsampled x1 channels

    # 3x3 conv as 9 accumulating MXU dots over lane-shifted tap views (no im2col temp).
    acc = jnp.zeros((cout_p, lw), jnp.float32)
    t = 0
    for dh in range(3):
        for dw in range(3):
            tap = xbuf_ref[:, dh * wp + dw: dh * wp + dw + lw]    # (Cin, H*Wp); dh*Wp is 128-aligned
            wt = w2_ref[:, t * cin:(t + 1) * cin]                 # (Cout_p, Cin)
            if USE_BF16_MXU_OPERANDS:
                tap = tap.astype(jnp.bfloat16)
                wt = wt.astype(jnp.bfloat16)
            acc = acc + jnp.dot(wt, tap, preferred_element_type=jnp.float32)
            t += 1

    # Fused bias-add + ReLU epilogue; lane-dense unmasked store, channels-first.
    y = jnp.maximum(acc + bias_ref[...], 0.0)
    out_ref[...] = y[None].astype(out_ref.dtype)


@jax.jit
def up_forward(x1_nchw, x2_nchw, w_hwio, gamma, beta, running_mean, running_var,
               eps=1e-5):
    """Up.forward(x1, x2) — NCHW in, NCHW out (PyTorch convention). Eval-mode BatchNorm."""
    n, c1, h1, w1 = x1_nchw.shape
    _, c2, h, w = x2_nchw.shape
    cin = c1 + c2
    cout = w_hwio.shape[-1]
    cout_p = ((cout + 7) // 8) * 8            # pad Cout to a sublane multiple
    wp = ((w + 2 + 127) // 128) * 128         # lane-tile-aligned padded row pitch (>= W+2)
    lp = (h + 3) * wp                         # flat padded length of the VMEM scratch
    lw = h * wp                               # lane width of the matmul / output

    # Bilinear x2 upsample (align_corners=True, matching nn.UpsamplingBilinear2d).
    mh = _bilinear_matrix(h1, h)
    mw = _bilinear_matrix(w1, w)
    x1u = jnp.einsum('oh,nchw->ncow', mh, x1_nchw)
    x1u = jnp.einsum('pw,ncow->ncop', mw, x1u).astype(jnp.float32)

    # Fold eval-mode BatchNorm into the conv: w' = w * scale (per out channel), b = beta - mean*scale.
    scale = gamma / jnp.sqrt(running_var + eps)
    bias = beta - running_mean * scale
    w2 = jnp.transpose(w_hwio * scale, (3, 0, 1, 2)).reshape(cout, 9 * cin).astype(jnp.float32)
    w2 = jnp.pad(w2, ((0, cout_p - cout), (0, 0)))                      # (Cout_p, 9*Cin)
    bias2 = jnp.pad(bias.reshape(cout, 1), ((0, cout_p - cout), (0, 0))).astype(jnp.float32)

    kernel = functools.partial(_conv_bn_relu_kernel, h=h, w=w, wp=wp, c2=c2, c1=c1)
    out_flat = pl.pallas_call(
        kernel,
        out_shape=jax.ShapeDtypeStruct((n, cout_p, lw), jnp.float32),
        grid=(n,),
        in_specs=[
            pl.BlockSpec((1, c2, h, w), lambda i: (i, 0, 0, 0)),
            pl.BlockSpec((1, c1, h, w), lambda i: (i, 0, 0, 0)),
            pl.BlockSpec((cout_p, 9 * cin), lambda i: (0, 0)),
            pl.BlockSpec((cout_p, 1), lambda i: (0, 0)),
        ],
        out_specs=pl.BlockSpec((1, cout_p, lw), lambda i: (i, 0, 0)),
        scratch_shapes=[pltpu.VMEM((cin, lp), jnp.float32)],
        compiler_params=pltpu.CompilerParams(
            dimension_semantics=("parallel",),
            vmem_limit_bytes=32 * 1024 * 1024,
        ),
    )(x2_nchw.astype(jnp.float32), x1u, w2, bias2)

    # Drop padded output channels and junk width columns; output is already channels-first (NCHW).
    return out_flat.reshape(n, cout_p, h, wp)[:, :cout, :, :w]


def _reference(x1_nchw, x2_nchw, w_hwio, gamma, beta, running_mean, running_var,
               eps=1e-5):
    """Plain-JAX reference (same math) for correctness checking."""
    x1 = jnp.transpose(x1_nchw, (0, 2, 3, 1))
    x2 = jnp.transpose(x2_nchw, (0, 2, 3, 1))
    mh = _bilinear_matrix(x1.shape[1], x2.shape[1])
    mw = _bilinear_matrix(x1.shape[2], x2.shape[2])
    x1u = jnp.einsum('oh,nhwc->nowc', mh, x1)
    x1u = jnp.einsum('pw,nowc->nopc', mw, x1u)
    x = jnp.concatenate([x2, x1u], axis=-1)
    y = jax.lax.conv_general_dilated(
        x, w_hwio, window_strides=(1, 1), padding='SAME',
        dimension_numbers=('NHWC', 'HWIO', 'NHWC'))
    y = (y - running_mean) / jnp.sqrt(running_var + eps) * gamma + beta
    y = jnp.maximum(y, 0.0)
    return jnp.transpose(y, (0, 3, 1, 2))


if __name__ == "__main__":
    # Up(in_channels=8, out_channels=4): x1 has 4 ch at half res, x2 has 4 ch at full res.
    key = jax.random.PRNGKey(0)
    k1, k2, kw, kg, kb, km, kv = jax.random.split(key, 7)

    N, C1, H1, W1 = 2, 4, 8, 8        # x1 (before 2x upsample)
    C2, H, W = 4, 16, 16              # x2
    Cin, Cout = C1 + C2, 4

    x1 = jax.random.normal(k1, (N, C1, H1, W1), dtype=jnp.float32)
    x2 = jax.random.normal(k2, (N, C2, H, W), dtype=jnp.float32)

    # deterministic parameter init (synthetic, no checkpoint)
    w_hwio = 0.1 * jax.random.normal(kw, (3, 3, Cin, Cout), dtype=jnp.float32)
    gamma = 1.0 + 0.1 * jax.random.normal(kg, (Cout,), dtype=jnp.float32)
    beta = 0.1 * jax.random.normal(kb, (Cout,), dtype=jnp.float32)
    running_mean = 0.1 * jax.random.normal(km, (Cout,), dtype=jnp.float32)
    running_var = jnp.abs(jax.random.normal(kv, (Cout,), dtype=jnp.float32)) + 0.5

    out = up_forward(x1, x2, w_hwio, gamma, beta, running_mean, running_var)
    out = jax.block_until_ready(out)

    ref = _reference(x1, x2, w_hwio, gamma, beta, running_mean, running_var)
    assert out.shape == (N, Cout, H, W), out.shape
    assert jnp.allclose(out, ref, atol=1e-4, rtol=1e-4), \
        float(jnp.max(jnp.abs(out - ref)))

    print("KERNEL_OK")
</pallas_src>

<mosaic_0001>
module attributes {stable_mosaic.version = 11 : i64} {
  func.func @_conv_bn_relu_kernel(%arg0: i32, %arg1: memref<1x4x16x16xf32, #tpu.memory_space<vmem>>, %arg2: memref<1x4x16x16xf32, #tpu.memory_space<vmem>>, %arg3: memref<8x72xf32, #tpu.memory_space<vmem>>, %arg4: memref<8x1xf32, #tpu.memory_space<vmem>>, %arg5: memref<1x8x2048xf32, #tpu.memory_space<vmem>>, %arg6: memref<8x2432xf32, #tpu.memory_space<vmem>>) attributes {dimension_semantics = [#tpu.dimension_semantics<parallel>], iteration_bounds = array<i64: 2>, scalar_prefetch = 0 : i64, scratch_operands = 1 : i64, tpu.core_type = #tpu.core_type<tc>, window_params = [{transform_indices = @transform_0, window_bounds = array<i64: 1, 4, 16, 16>}, {transform_indices = @transform_1, window_bounds = array<i64: 1, 4, 16, 16>}, {pipeline_mode = #tpu.pipeline_mode<synchronous>, transform_indices = @transform_2, window_bounds = array<i64: 8, 72>}, {pipeline_mode = #tpu.pipeline_mode<synchronous>, transform_indices = @transform_3, window_bounds = array<i64: 8, 1>}, {transform_indices = @transform_4, window_bounds = array<i64: 1, 8, 2048>}]} {
    %cst = arith.constant 0.000000e+00 : f32
    %0 = vector.broadcast %cst : f32 to vector<8x2432xf32>
    %c0 = arith.constant 0 : index
    %c0_0 = arith.constant 0 : index
    %1 = vector.load %arg6[%c0, %c0_0] : memref<8x2432xf32, #tpu.memory_space<vmem>>, vector<8x2432xf32>
    tpu.vector_store %arg6[%c0, %c0_0], %0 {strides = array<i32>} : memref<8x2432xf32, #tpu.memory_space<vmem>>, vector<8x2432xf32>,
    %c0_1 = arith.constant 0 : index
    %c0_2 = arith.constant 0 : index
    %c0_3 = arith.constant 0 : index
    %c0_4 = arith.constant 0 : index
    %2 = vector.load %arg1[%c0_1, %c0_2, %c0_3, %c0_4] : memref<1x4x16x16xf32, #tpu.memory_space<vmem>>, vector<1x4x1x16xf32>
    %3 = vector.shape_cast %2 : vector<1x4x1x16xf32> to vector<4x16xf32>
    %c0_5 = arith.constant 0 : index
    %c129 = arith.constant 129 : index
    %4 = vector.load %arg6[%c0_5, %c129] : memref<8x2432xf32, #tpu.memory_space<vmem>>, vector<4x16xf32>
    tpu.vector_store %arg6[%c0_5, %c129], %3 {strides = array<i32>} : memref<8x2432xf32, #tpu.memory_space<vmem>>, vector<4x16xf32>,
    %c0_6 = arith.constant 0 : index
    %c0_7 = arith.constant 0 : index
    %c0_8 = arith.constant 0 : index
    %c0_9 = arith.constant 0 : index
    %5 = vector.load %arg2[%c0_6, %c0_7, %c0_8, %c0_9] : memref<1x4x16x16xf32, #tpu.memory_space<vmem>>, vector<1x4x1x16xf32>
    %6 = vector.shape_cast %5 : vector<1x4x1x16xf32> to vector<4x16xf32>
    %c4 = arith.constant 4 : index
    %c129_10 = arith.constant 129 : index
    %7 = vector.load %arg6[%c4, %c129_10] : memref<8x2432xf32, #tpu.memory_space<vmem>>, vector<4x16xf32>
    tpu.vector_store %arg6[%c4, %c129_10], %6 {strides = array<i32>} : memref<8x2432xf32, #tpu.memory_space<vmem>>, vector<4x16xf32>,
    %c0_11 = arith.constant 0 : index
    %c0_12 = arith.constant 0 : index
    %c1 = arith.constant 1 : index
    %c0_13 = arith.constant 0 : index
    %8 = vector.load %arg1[%c0_11, %c0_12, %c1, %c0_13] : memref<1x4x16x16xf32, #tpu.memory_space<vmem>>, vector<1x4x1x16xf32>
    %9 = vector.shape_cast %8 : vector<1x4x1x16xf32> to vector<4x16xf32>
    %c0_14 = arith.constant 0 : index
    %c257 = arith.constant 257 : index
    %10 = vector.load %arg6[%c0_14, %c257] : memref<8x2432xf32, #tpu.memory_space<vmem>>, vector<4x16xf32>
    tpu.vector_store %arg6[%c0_14, %c257], %9 {strides = array<i32>} : memref<8x2432xf32, #tpu.memory_space<vmem>>, vector<4x16xf32>,
    %c0_15 = arith.constant 0 : index
    %c0_16 = arith.constant 0 : index
    %c1_17 = arith.constant 1 : index
    %c0_18 = arith.constant 0 : index
    %11 = vector.load %arg2[%c0_15, %c0_16, %c1_17, %c0_18] : memref<1x4x16x16xf32, #tpu.memory_space<vmem>>, vector<1x4x1x16xf32>
    %12 = vector.shape_cast %11 : vector<1x4x1x16xf32> to vector<4x16xf32>
    %c4_19 = arith.constant 4 : index
    %c257_20 = arith.constant 257 : index
    %13 = vector.load %arg6[%c4_19, %c257_20] : memref<8x2432xf32, #tpu.memory_space<vmem>>, vector<4x16xf32>
    tpu.vector_store %arg6[%c4_19, %c257_20], %12 {strides = array<i32>} : memref<8x2432xf32, #tpu.memory_space<vmem>>, vector<4x16xf32>,
    %c0_21 = arith.constant 0 : index
    %c0_22 = arith.constant 0 : index
    %c2 = arith.constant 2 : index
    %c0_23 = arith.constant 0 : index
    %14 = vector.load %arg1[%c0_21, %c0_22, %c2, %c0_23] : memref<1x4x16x16xf32, #tpu.memory_space<vmem>>, vector<1x4x1x16xf32>
    %15 = vector.shape_cast %14 : vector<1x4x1x16xf32> to vector<4x16xf32>
    %c0_24 = arith.constant 0 : index
    %c385 = arith.constant 385 : index
    %16 = vector.load %arg6[%c0_24, %c385] : memref<8x2432xf32, #tpu.memory_space<vmem>>, vector<4x16xf32>
    tpu.vector_store %arg6[%c0_24, %c385], %15 {strides = array<i32>} : memref<8x2432xf32, #tpu.memory_space<vmem>>, vector<4x16xf32>,
    %c0_25 = arith.constant 0 : index
    %c0_26 = arith.constant 0 : index
    %c2_27 = arith.constant 2 : index
    %c0_28 = arith.constant 0 : index
    %17 = vector.load %arg2[%c0_25, %c0_26, %c2_27, %c0_28] : memref<1x4x16x16xf32, #tpu.memory_space<vmem>>, vector<1x4x1x16xf32>
    %18 = vector.shape_cast %17 : vector<1x4x1x16xf32> to vector<4x16xf32>
    %c4_29 = arith.constant 4 : index
    %c385_30 = arith.constant 385 : index
    %19 = vector.load %arg6[%c4_29, %c385_30] : memref<8x2432xf32, #tpu.memory_space<vmem>>, vector<4x16xf32>
    tpu.vector_store %arg6[%c4_29, %c385_30], %18 {strides = array<i32>} : memref<8x2432xf32, #tpu.memory_space<vmem>>, vector<4x16xf32>,
    %c0_31 = arith.constant 0 : index
    %c0_32 = arith.constant 0 : index
    %c3 = arith.constant 3 : index
    %c0_33 = arith.constant 0 : index
    %20 = vector.load %arg1[%c0_31, %c0_32, %c3, %c0_33] : memref<1x4x16x16xf32, #tpu.memory_space<vmem>>, vector<1x4x1x16xf32>
    %21 = vector.shape_cast %20 : vector<1x4x1x16xf32> to vector<4x16xf32>
    %c0_34 = arith.constant 0 : index
    %c513 = arith.constant 513 : index
    %22 = vector.load %arg6[%c0_34, %c513] : memref<8x2432xf32, #tpu.memory_space<vmem>>, vector<4x16xf32>
    tpu.vector_store %arg6[%c0_34, %c513], %21 {strides = array<i32>} : memref<8x2432xf32, #tpu.memory_space<vmem>>, vector<4x16xf32>,
    %c0_35 = arith.constant 0 : index
    %c0_36 = arith.constant 0 : index
    %c3_37 = arith.constant 3 : index
    %c0_38 = arith.constant 0 : index
    %23 = vector.load %arg2[%c0_35, %c0_36, %c3_37, %c0_38] : memref<1x4x16x16xf32, #tpu.memory_space<vmem>>, vector<1x4x1x16xf32>
    %24 = vector.shape_cast %23 : vector<1x4x1x16xf32> to vector<4x16xf32>
    %c4_39 = arith.constant 4 : index
    %c513_40 = arith.constant 513 : index
    %25 = vector.load %arg6[%c4_39, %c513_40] : memref<8x2432xf32, #tpu.memory_space<vmem>>, vector<4x16xf32>
    tpu.vector_store %arg6[%c4_39, %c513_40], %24 {strides = array<i32>} : memref<8x2432xf32, #tpu.memory_space<vmem>>, vector<4x16xf32>,
    %c0_41 = arith.constant 0 : index
    %c0_42 = arith.constant 0 : index
    %c4_43 = arith.constant 4 : index
    %c0_44 = arith.constant 0 : index
    %26 = vector.load %arg1[%c0_41, %c0_42, %c4_43, %c0_44] : memref<1x4x16x16xf32, #tpu.memory_space<vmem>>, vector<1x4x1x16xf32>
    %27 = vector.shape_cast %26 : vector<1x4x1x16xf32> to vector<4x16xf32>
    %c0_45 = arith.constant 0 : index
    %c641 = arith.constant 641 : index
    %28 = vector.load %arg6[%c0_45, %c641] : memref<8x2432xf32, #tpu.memory_space<vmem>>, vector<4x16xf32>
    tpu.vector_store %arg6[%c0_45, %c641], %27 {strides = array<i32>} : memref<8x2432xf32, #tpu.memory_space<vmem>>, vector<4x16xf32>,
    %c0_46 = arith.constant 0 : index
    %c0_47 = arith.constant 0 : index
    %c4_48 = arith.constant 4 : index
    %c0_49 = arith.constant 0 : index
    %29 = vector.load %arg2[%c0_46, %c0_47, %c4_48, %c0_49] : memref<1x4x16x16xf32, #tpu.memory_space<vmem>>, vector<1x4x1x16xf32>
    %30 = vector.shape_cast %29 : vector<1x4x1x16xf32> to vector<4x16xf32>
    %c4_50 = arith.constant 4 : index
    %c641_51 = arith.constant 641 : index
    %31 = vector.load %arg6[%c4_50, %c641_51] : memref<8x2432xf32, #tpu.memory_space<vmem>>, vector<4x16xf32>
    tpu.vector_store %arg6[%c4_50, %c641_51], %30 {strides = array<i32>} : memref<8x2432xf32, #tpu.memory_space<vmem>>, vector<4x16xf32>,
    %c0_52 = arith.constant 0 : index
    %c0_53 = arith.constant 0 : index
    %c5 = arith.constant 5 : index
    %c0_54 = arith.constant 0 : index
    %32 = vector.load %arg1[%c0_52, %c0_53, %c5, %c0_54] : memref<1x4x16x16xf32, #tpu.memory_space<vmem>>, vector<1x4x1x16xf32>
    %33 = vector.shape_cast %32 : vector<1x4x1x16xf32> to vector<4x16xf32>
    %c0_55 = arith.constant 0 : index
    %c769 = arith.constant 769 : index
    %34 = vector.load %arg6[%c0_55, %c769] : memref<8x2432xf32, #tpu.memory_space<vmem>>, vector<4x16xf32>
    tpu.vector_store %arg6[%c0_55, %c769], %33 {strides = array<i32>} : memref<8x2432xf32, #tpu.memory_space<vmem>>, vector<4x16xf32>,
    %c0_56 = arith.constant 0 : index
    %c0_57 = arith.constant 0 : index
    %c5_58 = arith.constant 5 : index
    %c0_59 = arith.constant 0 : index
    %35 = vector.load %arg2[%c0_56, %c0_57, %c5_58, %c0_59] : memref<1x4x16x16xf32, #tpu.memory_space<vmem>>, vector<1x4x1x16xf32>
    %36 = vector.shape_cast %35 : vector<1x4x1x16xf32> to vector<4x16xf32>
    %c4_60 = arith.constant 4 : index
    %c769_61 = arith.constant 769 : index
    %37 = vector.load %arg6[%c4_60, %c769_61] : memref<8x2432xf32, #tpu.memory_space<vmem>>, vector<4x16xf32>
    tpu.vector_store %arg6[%c4_60, %c769_61], %36 {strides = array<i32>} : memref<8x2432xf32, #tpu.memory_space<vmem>>, vector<4x16xf32>,
    %c0_62 = arith.constant 0 : index
    %c0_63 = arith.constant 0 : index
    %c6 = arith.constant 6 : index
    %c0_64 = arith.constant 0 : index
    %38 = vector.load %arg1[%c0_62, %c0_63, %c6, %c0_64] : memref<1x4x16x16xf32, #tpu.memory_space<vmem>>, vector<1x4x1x16xf32>
    %39 = vector.shape_cast %38 : vector<1x4x1x16xf32> to vector<4x16xf32>
    %c0_65 = arith.constant 0 : index
    %c897 = arith.constant 897 : index
    %40 = vector.load %arg6[%c0_65, %c897] : memref<8x2432xf32, #tpu.memory_space<vmem>>, vector<4x16xf32>
    tpu.vector_store %arg6[%c0_65, %c897], %39 {strides = array<i32>} : memref<8x2432xf32, #tpu.memory_space<vmem>>, vector<4x16xf32>,
    %c0_66 = arith.constant 0 : index
    %c0_67 = arith.constant 0 : index
    %c6_68 = arith.constant 6 : index
    %c0_69 = arith.constant 0 : index
    %41 = vector.load %arg2[%c0_66, %c0_67, %c6_68, %c0_69] : memref<1x4x16x16xf32, #tpu.memory_space<vmem>>, vector<1x4x1x16xf32>
    %42 = vector.shape_cast %41 : vector<1x4x1x16xf32> to vector<4x16xf32>
    %c4_70 = arith.constant 4 : index
    %c897_71 = arith.constant 897 : index
    %43 = vector.load %arg6[%c4_70, %c897_71] : memref<8x2432xf32, #tpu.memory_space<vmem>>, vector<4x16xf32>
    tpu.vector_store %arg6[%c4_70, %c897_71], %42 {strides = array<i32>} : memref<8x2432xf32, #tpu.memory_space<vmem>>, vector<4x16xf32>,
    %c0_72 = arith.constant 0 : index
    %c0_73 = arith.constant 0 : index
    %c7 = arith.constant 7 : index
    %c0_74 = arith.constant 0 : index
    %44 = vector.load %arg1[%c0_72, %c0_73, %c7, %c0_74] : memref<1x4x16x16xf32, #tpu.memory_space<vmem>>, vector<1x4x1x16xf32>
    %45 = vector.shape_cast %44 : vector<1x4x1x16xf32> to vector<4x16xf32>
    %c0_75 = arith.constant 0 : index
    %c1025 = arith.constant 1025 : index
    %46 = vector.load %arg6[%c0_75, %c1025] : memref<8x2432xf32, #tpu.memory_space<vmem>>, vector<4x16xf32>
    tpu.vector_store %arg6[%c0_75, %c1025], %45 {strides = array<i32>} : memref<8x2432xf32, #tpu.memory_space<vmem>>, vector<4x16xf32>,
    %c0_76 = arith.constant 0 : index
    %c0_77 = arith.constant 0 : index
    %c7_78 = arith.constant 7 : index
    %c0_79 = arith.constant 0 : index
    %47 = vector.load %arg2[%c0_76, %c0_77, %c7_78, %c0_79] : memref<1x4x16x16xf32, #tpu.memory_space<vmem>>, vector<1x4x1x16xf32>
    %48 = vector.shape_cast %47 : vector<1x4x1x16xf32> to vector<4x16xf32>
    %c4_80 = arith.constant 4 : index
    %c1025_81 = arith.constant 1025 : index
    %49 = vector.load %arg6[%c4_80, %c1025_81] : memref<8x2432xf32, #tpu.memory_space<vmem>>, vector<4x16xf32>
    tpu.vector_store %arg6[%c4_80, %c1025_81], %48 {strides = array<i32>} : memref<8x2432xf32, #tpu.memory_space<vmem>>, vector<4x16xf32>,
    %c0_82 = arith.constant 0 : index
    %c0_83 = arith.constant 0 : index
    %c8 = arith.constant 8 : index
    %c0_84 = arith.constant 0 : index
    %50 = vector.load %arg1[%c0_82, %c0_83, %c8, %c0_84] : memref<1x4x16x16xf32, #tpu.memory_space<vmem>>, vector<1x4x1x16xf32>
    %51 = vector.shape_cast %50 : vector<1x4x1x16xf32> to vector<4x16xf32>
    %c0_85 = arith.constant 0 : index
    %c1153 = arith.constant 1153 : index
    %52 = vector.load %arg6[%c0_85, %c1153] : memref<8x2432xf32, #tpu.memory_space<vmem>>, vector<4x16xf32>
    tpu.vector_store %arg6[%c0_85, %c1153], %51 {strides = array<i32>} : memref<8x2432xf32, #tpu.memory_space<vmem>>, vector<4x16xf32>,
    %c0_86 = arith.constant 0 : index
    %c0_87 = arith.constant 0 : index
    %c8_88 = arith.constant 8 : index
    %c0_89 = arith.constant 0 : index
    %53 = vector.load %arg2[%c0_86, %c0_87, %c8_88, %c0_89] : memref<1x4x16x16xf32, #tpu.memory_space<vmem>>, vector<1x4x1x16xf32>
    %54 = vector.shape_cast %53 : vector<1x4x1x16xf32> to vector<4x16xf32>
    %c4_90 = arith.constant 4 : index
    %c1153_91 = arith.constant 1153 : index
    %55 = vector.load %arg6[%c4_90, %c1153_91] : memref<8x2432xf32, #tpu.memory_space<vmem>>, vector<4x16xf32>
    tpu.vector_store %arg6[%c4_90, %c1153_91], %54 {strides = array<i32>} : memref<8x2432xf32, #tpu.memory_space<vmem>>, vector<4x16xf32>,
    %c0_92 = arith.constant 0 : index
    %c0_93 = arith.constant 0 : index
    %c9 = arith.constant 9 : index
    %c0_94 = arith.constant 0 : index
    %56 = vector.load %arg1[%c0_92, %c0_93, %c9, %c0_94] : memref<1x4x16x16xf32, #tpu.memory_space<vmem>>, vector<1x4x1x16xf32>
    %57 = vector.shape_cast %56 : vector<1x4x1x16xf32> to vector<4x16xf32>
    %c0_95 = arith.constant 0 : index
    %c1281 = arith.constant 1281 : index
    %58 = vector.load %arg6[%c0_95, %c1281] : memref<8x2432xf32, #tpu.memory_space<vmem>>, vector<4x16xf32>
    tpu.vector_store %arg6[%c0_95, %c1281], %57 {strides = array<i32>} : memref<8x2432xf32, #tpu.memory_space<vmem>>, vector<4x16xf32>,
    %c0_96 = arith.constant 0 : index
    %c0_97 = arith.constant 0 : index
    %c9_98 = arith.constant 9 : index
    %c0_99 = arith.constant 0 : index
    %59 = vector.load %arg2[%c0_96, %c0_97, %c9_98, %c0_99] : memref<1x4x16x16xf32, #tpu.memory_space<vmem>>, vector<1x4x1x16xf32>
    %60 = vector.shape_cast %59 : vector<1x4x1x16xf32> to vector<4x16xf32>
    %c4_100 = arith.constant 4 : index
    %c1281_101 = arith.constant 1281 : index
    %61 = vector.load %arg6[%c4_100, %c1281_101] : memref<8x2432xf32, #tpu.memory_space<vmem>>, vector<4x16xf32>
    tpu.vector_store %arg6[%c4_100, %c1281_101], %60 {strides = array<i32>} : memref<8x2432xf32, #tpu.memory_space<vmem>>, vector<4x16xf32>,
    %c0_102 = arith.constant 0 : index
    %c0_103 = arith.constant 0 : index
    %c10 = arith.constant 10 : index
    %c0_104 = arith.constant 0 : index
    %62 = vector.load %arg1[%c0_102, %c0_103, %c10, %c0_104] : memref<1x4x16x16xf32, #tpu.memory_space<vmem>>, vector<1x4x1x16xf32>
    %63 = vector.shape_cast %62 : vector<1x4x1x16xf32> to vector<4x16xf32>
    %c0_105 = arith.constant 0 : index
    %c1409 = arith.constant 1409 : index
    %64 = vector.load %arg6[%c0_105, %c1409] : memref<8x2432xf32, #tpu.memory_space<vmem>>, vector<4x16xf32>
    tpu.vector_store %arg6[%c0_105, %c1409], %63 {strides = array<i32>} : memref<8x2432xf32, #tpu.memory_space<vmem>>, vector<4x16xf32>,
    %c0_106 = arith.constant 0 : index
    %c0_107 = arith.constant 0 : index
    %c10_108 = arith.constant 10 : index
    %c0_109 = arith.constant 0 : index
    %65 = vector.load %arg2[%c0_106, %c0_107, %c10_108, %c0_109] : memref<1x4x16x16xf32, #tpu.memory_space<vmem>>, vector<1x4x1x16xf32>
    %66 = vector.shape_cast %65 : vector<1x4x1x16xf32> to vector<4x16xf32>
    %c4_110 = arith.constant 4 : index
    %c1409_111 = arith.constant 1409 : index
    %67 = vector.load %arg6[%c4_110, %c1409_111] : memref<8x2432xf32, #tpu.memory_space<vmem>>, vector<4x16xf32>
    tpu.vector_store %arg6[%c4_110, %c1409_111], %66 {strides = array<i32>} : memref<8x2432xf32, #tpu.memory_space<vmem>>, vector<4x16xf32>,
    %c0_112 = arith.constant 0 : index
    %c0_113 = arith.constant 0 : index
    %c11 = arith.constant 11 : index
    %c0_114 = arith.constant 0 : index
    %68 = vector.load %arg1[%c0_112, %c0_113, %c11, %c0_114] : memref<1x4x16x16xf32, #tpu.memory_space<vmem>>, vector<1x4x1x16xf32>
    %69 = vector.shape_cast %68 : vector<1x4x1x16xf32> to vector<4x16xf32>
    %c0_115 = arith.constant 0 : index
    %c1537 = arith.constant 1537 : index
    %70 = vector.load %arg6[%c0_115, %c1537] : memref<8x2432xf32, #tpu.memory_space<vmem>>, vector<4x16xf32>
    tpu.vector_store %arg6[%c0_115, %c1537], %69 {strides = array<i32>} : memref<8x2432xf32, #tpu.memory_space<vmem>>, vector<4x16xf32>,
    %c0_116 = arith.constant 0 : index
    %c0_117 = arith.constant 0 : index
    %c11_118 = arith.constant 11 : index
    %c0_119 = arith.constant 0 : index
    %71 = vector.load %arg2[%c0_116, %c0_117, %c11_118, %c0_119] : memref<1x4x16x16xf32, #tpu.memory_space<vmem>>, vector<1x4x1x16xf32>
    %72 = vector.shape_cast %71 : vector<1x4x1x16xf32> to vector<4x16xf32>
    %c4_120 = arith.constant 4 : index
    %c1537_121 = arith.constant 1537 : index
    %73 = vector.load %arg6[%c4_120, %c1537_121] : memref<8x2432xf32, #tpu.memory_space<vmem>>, vector<4x16xf32>
    tpu.vector_store %arg6[%c4_120, %c1537_121], %72 {strides = array<i32>} : memref<8x2432xf32, #tpu.memory_space<vmem>>, vector<4x16xf32>,
    %c0_122 = arith.constant 0 : index
    %c0_123 = arith.constant 0 : index
    %c12 = arith.constant 12 : index
    %c0_124 = arith.constant 0 : index
    %74 = vector.load %arg1[%c0_122, %c0_123, %c12, %c0_124] : memref<1x4x16x16xf32, #tpu.memory_space<vmem>>, vector<1x4x1x16xf32>
    %75 = vector.shape_cast %74 : vector<1x4x1x16xf32> to vector<4x16xf32>
    %c0_125 = arith.constant 0 : index
    %c1665 = arith.constant 1665 : index
    %76 = vector.load %arg6[%c0_125, %c1665] : memref<8x2432xf32, #tpu.memory_space<vmem>>, vector<4x16xf32>
    tpu.vector_store %arg6[%c0_125, %c1665], %75 {strides = array<i32>} : memref<8x2432xf32, #tpu.memory_space<vmem>>, vector<4x16xf32>,
    %c0_126 = arith.constant 0 : index
    %c0_127 = arith.constant 0 : index
    %c12_128 = arith.constant 12 : index
    %c0_129 = arith.constant 0 : index
    %77 = vector.load %arg2[%c0_126, %c0_127, %c12_128, %c0_129] : memref<1x4x16x16xf32, #tpu.memory_space<vmem>>, vector<1x4x1x16xf32>
    %78 = vector.shape_cast %77 : vector<1x4x1x16xf32> to vector<4x16xf32>
    %c4_130 = arith.constant 4 : index
    %c1665_131 = arith.constant 1665 : index
    %79 = vector.load %arg6[%c4_130, %c1665_131] : memref<8x2432xf32, #tpu.memory_space<vmem>>, vector<4x16xf32>
    tpu.vector_store %arg6[%c4_130, %c1665_131], %78 {strides = array<i32>} : memref<8x2432xf32, #tpu.memory_space<vmem>>, vector<4x16xf32>,
    %c0_132 = arith.constant 0 : index
    %c0_133 = arith.constant 0 : index
    %c13 = arith.constant 13 : index
    %c0_134 = arith.constant 0 : index
    %80 = vector.load %arg1[%c0_132, %c0_133, %c13, %c0_134] : memref<1x4x16x16xf32, #tpu.memory_space<vmem>>, vector<1x4x1x16xf32>
    %81 = vector.shape_cast %80 : vector<1x4x1x16xf32> to vector<4x16xf32>
    %c0_135 = arith.constant 0 : index
    %c1793 = arith.constant 1793 : index
    %82 = vector.load %arg6[%c0_135, %c1793] : memref<8x2432xf32, #tpu.memory_space<vmem>>, vector<4x16xf32>
    tpu.vector_store %arg6[%c0_135, %c1793], %81 {strides = array<i32>} : memref<8x2432xf32, #tpu.memory_space<vmem>>, vector<4x16xf32>,
    %c0_136 = arith.constant 0 : index
    %c0_137 = arith.constant 0 : index
    %c13_138 = arith.constant 13 : index
    %c0_139 = arith.constant 0 : index
    %83 = vector.load %arg2[%c0_136, %c0_137, %c13_138, %c0_139] : memref<1x4x16x16xf32, #tpu.memory_space<vmem>>, vector<1x4x1x16xf32>
    %84 = vector.shape_cast %83 : vector<1x4x1x16xf32> to vector<4x16xf32>
    %c4_140 = arith.constant 4 : index
    %c1793_141 = arith.constant 1793 : index
    %85 = vector.load %arg6[%c4_140, %c1793_141] : memref<8x2432xf32, #tpu.memory_space<vmem>>, vector<4x16xf32>
    tpu.vector_store %arg6[%c4_140, %c1793_141], %84 {strides = array<i32>} : memref<8x2432xf32, #tpu.memory_space<vmem>>, vector<4x16xf32>,
    %c0_142 = arith.constant 0 : index
    %c0_143 = arith.constant 0 : index
    %c14 = arith.constant 14 : index
    %c0_144 = arith.constant 0 : index
    %86 = vector.load %arg1[%c0_142, %c0_143, %c14, %c0_144] : memref<1x4x16x16xf32, #tpu.memory_space<vmem>>, vector<1x4x1x16xf32>
    %87 = vector.shape_cast %86 : vector<1x4x1x16xf32> to vector<4x16xf32>
    %c0_145 = arith.constant 0 : index
    %c1921 = arith.constant 1921 : index
    %88 = vector.load %arg6[%c0_145, %c1921] : memref<8x2432xf32, #tpu.memory_space<vmem>>, vector<4x16xf32>
    tpu.vector_store %arg6[%c0_145, %c1921], %87 {strides = array<i32>} : memref<8x2432xf32, #tpu.memory_space<vmem>>, vector<4x16xf32>,
    %c0_146 = arith.constant 0 : index
    %c0_147 = arith.constant 0 : index
    %c14_148 = arith.constant 14 : index
    %c0_149 = arith.constant 0 : index
    %89 = vector.load %arg2[%c0_146, %c0_147, %c14_148, %c0_149] : memref<1x4x16x16xf32, #tpu.memory_space<vmem>>, vector<1x4x1x16xf32>
    %90 = vector.shape_cast %89 : vector<1x4x1x16xf32> to vector<4x16xf32>
    %c4_150 = arith.constant 4 : index
    %c1921_151 = arith.constant 1921 : index
    %91 = vector.load %arg6[%c4_150, %c1921_151] : memref<8x2432xf32, #tpu.memory_space<vmem>>, vector<4x16xf32>
    tpu.vector_store %arg6[%c4_150, %c1921_151], %90 {strides = array<i32>} : memref<8x2432xf32, #tpu.memory_space<vmem>>, vector<4x16xf32>,
    %c0_152 = arith.constant 0 : index
    %c0_153 = arith.constant 0 : index
    %c15 = arith.constant 15 : index
    %c0_154 = arith.constant 0 : index
    %92 = vector.load %arg1[%c0_152, %c0_153, %c15, %c0_154] : memref<1x4x16x16xf32, #tpu.memory_space<vmem>>, vector<1x4x1x16xf32>
    %93 = vector.shape_cast %92 : vector<1x4x1x16xf32> to vector<4x16xf32>
    %c0_155 = arith.constant 0 : index
    %c2049 = arith.constant 2049 : index
    %94 = vector.load %arg6[%c0_155, %c2049] : memref<8x2432xf32, #tpu.memory_space<vmem>>, vector<4x16xf32>
    tpu.vector_store %arg6[%c0_155, %c2049], %93 {strides = array<i32>} : memref<8x2432xf32, #tpu.memory_space<vmem>>, vector<4x16xf32>,
    %c0_156 = arith.constant 0 : index
    %c0_157 = arith.constant 0 : index
    %c15_158 = arith.constant 15 : index
    %c0_159 = arith.constant 0 : index
    %95 = vector.load %arg2[%c0_156, %c0_157, %c15_158, %c0_159] : memref<1x4x16x16xf32, #tpu.memory_space<vmem>>, vector<1x4x1x16xf32>
    %96 = vector.shape_cast %95 : vector<1x4x1x16xf32> to vector<4x16xf32>
    %c4_160 = arith.constant 4 : index
    %c2049_161 = arith.constant 2049 : index
    %97 = vector.load %arg6[%c4_160, %c2049_161] : memref<8x2432xf32, #tpu.memory_space<vmem>>, vector<4x16xf32>
    tpu.vector_store %arg6[%c4_160, %c2049_161], %96 {strides = array<i32>} : memref<8x2432xf32, #tpu.memory_space<vmem>>, vector<4x16xf32>,
    %cst_162 = arith.constant 0.000000e+00 : f32
    %98 = vector.broadcast %cst_162 : f32 to vector<8x2048xf32>
    %c0_163 = arith.constant 0 : index
    %c0_164 = arith.constant 0 : index
    %99 = vector.load %arg6[%c0_163, %c0_164] : memref<8x2432xf32, #tpu.memory_space<vmem>>, vector<8x2048xf32>
    %c0_165 = arith.constant 0 : index
    %c0_166 = arith.constant 0 : index
    %100 = vector.load %arg3[%c0_165, %c0_166] : memref<8x72xf32, #tpu.memory_space<vmem>>, vector<8x8xf32>
    %cst_167 = arith.constant dense<0.000000e+00> : vector<8x2048xf32>
    %101 = tpu.matmul %100, %99, %cst_167 {dimension_numbers = #tpu.dot_dimension_numbers<[1], [0], [0], [1], [0, 0, 1, 1], [], []>} : vector<8x8xf32>, vector<8x2048xf32>, vector<8x2048xf32> -> vector<8x2048xf32>
    %102 = arith.addf %98, %101 : vector<8x2048xf32>
    %c0_168 = arith.constant 0 : index
    %c1_169 = arith.constant 1 : index
    %103 = vector.load %arg6[%c0_168, %c1_169] : memref<8x2432xf32, #tpu.memory_space<vmem>>, vector<8x2048xf32>
    %c0_170 = arith.constant 0 : index
    %c8_171 = arith.constant 8 : index
    %104 = vector.load %arg3[%c0_170, %c8_171] : memref<8x72xf32, #tpu.memory_space<vmem>>, vector<8x8xf32>
    %cst_172 = arith.constant dense<0.000000e+00> : vector<8x2048xf32>
    %105 = tpu.matmul %104, %103, %cst_172 {dimension_numbers = #tpu.dot_dimension_numbers<[1], [0], [0], [1], [0, 0, 1, 1], [], []>} : vector<8x8xf32>, vector<8x2048xf32>, vector<8x2048xf32> -> vector<8x2048xf32>
    %106 = arith.addf %102, %105 : vector<8x2048xf32>
    %c0_173 = arith.constant 0 : index
    %c2_174 = arith.constant 2 : index
    %107 = vector.load %arg6[%c0_173, %c2_174] : memref<8x2432xf32, #tpu.memory_space<vmem>>, vector<8x2048xf32>
    %c0_175 = arith.constant 0 : index
    %c16 = arith.constant 16 : index
    %108 = vector.load %arg3[%c0_175, %c16] : memref<8x72xf32, #tpu.memory_space<vmem>>, vector<8x8xf32>
    %cst_176 = arith.constant dense<0.000000e+00> : vector<8x2048xf32>
    %109 = tpu.matmul %108, %107, %cst_176 {dimension_numbers = #tpu.dot_dimension_numbers<[1], [0], [0], [1], [0, 0, 1, 1], [], []>} : vector<8x8xf32>, vector<8x2048xf32>, vector<8x2048xf32> -> vector<8x2048xf32>
    %110 = arith.addf %106, %109 : vector<8x2048xf32>
    %c0_177 = arith.constant 0 : index
    %c128 = arith.constant 128 : index
    %111 = vector.load %arg6[%c0_177, %c128] : memref<8x2432xf32, #tpu.memory_space<vmem>>, vector<8x2048xf32>
    %c0_178 = arith.constant 0 : index
    %c24 = arith.constant 24 : index
    %112 = vector.load %arg3[%c0_178, %c24] : memref<8x72xf32, #tpu.memory_space<vmem>>, vector<8x8xf32>
    %cst_179 = arith.constant dense<0.000000e+00> : vector<8x2048xf32>
    %113 = tpu.matmul %112, %111, %cst_179 {dimension_numbers = #tpu.dot_dimension_numbers<[1], [0], [0], [1], [0, 0, 1, 1], [], []>} : vector<8x8xf32>, vector<8x2048xf32>, vector<8x2048xf32> -> vector<8x2048xf32>
    %114 = arith.addf %110, %113 : vector<8x2048xf32>
    %c0_180 = arith.constant 0 : index
    %c129_181 = arith.constant 129 : index
    %115 = vector.load %arg6[%c0_180, %c129_181] : memref<8x2432xf32, #tpu.memory_space<vmem>>, vector<8x2048xf32>
    %c0_182 = arith.constant 0 : index
    %c32 = arith.constant 32 : index
    %116 = vector.load %arg3[%c0_182, %c32] : memref<8x72xf32, #tpu.memory_space<vmem>>, vector<8x8xf32>
    %cst_183 = arith.constant dense<0.000000e+00> : vector<8x2048xf32>
    %117 = tpu.matmul %116, %115, %cst_183 {dimension_numbers = #tpu.dot_dimension_numbers<[1], [0], [0], [1], [0, 0, 1, 1], [], []>} : vector<8x8xf32>, vector<8x2048xf32>, vector<8x2048xf32> -> vector<8x2048xf32>
    %118 = arith.addf %114, %117 : vector<8x2048xf32>
    %c0_184 = arith.constant 0 : index
    %c130 = arith.constant 130 : index
    %119 = vector.load %arg6[%c0_184, %c130] : memref<8x2432xf32, #tpu.memory_space<vmem>>, vector<8x2048xf32>
    %c0_185 = arith.constant 0 : index
    %c40 = arith.constant 40 : index
    %120 = vector.load %arg3[%c0_185, %c40] : memref<8x72xf32, #tpu.memory_space<vmem>>, vector<8x8xf32>
    %cst_186 = arith.constant dense<0.000000e+00> : vector<8x2048xf32>
    %121 = tpu.matmul %120, %119, %cst_186 {dimension_numbers = #tpu.dot_dimension_numbers<[1], [0], [0], [1], [0, 0, 1, 1], [], []>} : vector<8x8xf32>, vector<8x2048xf32>, vector<8x2048xf32> -> vector<8x2048xf32>
    %122 = arith.addf %118, %121 : vector<8x2048xf32>
    %c0_187 = arith.constant 0 : index
    %c256 = arith.constant 256 : index
    %123 = vector.load %arg6[%c0_187, %c256] : memref<8x2432xf32, #tpu.memory_space<vmem>>, vector<8x2048xf32>
    %c0_188 = arith.constant 0 : index
    %c48 = arith.constant 48 : index
    %124 = vector.load %arg3[%c0_188, %c48] : memref<8x72xf32, #tpu.memory_space<vmem>>, vector<8x8xf32>
    %cst_189 = arith.constant dense<0.000000e+00> : vector<8x2048xf32>
    %125 = tpu.matmul %124, %123, %cst_189 {dimension_numbers = #tpu.dot_dimension_numbers<[1], [0], [0], [1], [0, 0, 1, 1], [], []>} : vector<8x8xf32>, vector<8x2048xf32>, vector<8x2048xf32> -> vector<8x2048xf32>
    %126 = arith.addf %122, %125 : vector<8x2048xf32>
    %c0_190 = arith.constant 0 : index
    %c257_191 = arith.constant 257 : index
    %127 = vector.load %arg6[%c0_190, %c257_191] : memref<8x2432xf32, #tpu.memory_space<vmem>>, vector<8x2048xf32>
    %c0_192 = arith.constant 0 : index
    %c56 = arith.constant 56 : index
    %128 = vector.load %arg3[%c0_192, %c56] : memref<8x72xf32, #tpu.memory_space<vmem>>, vector<8x8xf32>
    %cst_193 = arith.constant dense<0.000000e+00> : vector<8x2048xf32>
    %129 = tpu.matmul %128, %127, %cst_193 {dimension_numbers = #tpu.dot_dimension_numbers<[1], [0], [0], [1], [0, 0, 1, 1], [], []>} : vector<8x8xf32>, vector<8x2048xf32>, vector<8x2048xf32> -> vector<8x2048xf32>
    %130 = arith.addf %126, %129 : vector<8x2048xf32>
    %c0_194 = arith.constant 0 : index
    %c258 = arith.constant 258 : index
    %131 = vector.load %arg6[%c0_194, %c258] : memref<8x2432xf32, #tpu.memory_space<vmem>>, vector<8x2048xf32>
    %c0_195 = arith.constant 0 : index
    %c64 = arith.constant 64 : index
    %132 = vector.load %arg3[%c0_195, %c64] : memref<8x72xf32, #tpu.memory_space<vmem>>, vector<8x8xf32>
    %cst_196 = arith.constant dense<0.000000e+00> : vector<8x2048xf32>
    %133 = tpu.matmul %132, %131, %cst_196 {dimension_numbers = #tpu.dot_dimension_numbers<[1], [0], [0], [1], [0, 0, 1, 1], [], []>} : vector<8x8xf32>, vector<8x2048xf32>, vector<8x2048xf32> -> vector<8x2048xf32>
    %134 = arith.addf %130, %133 : vector<8x2048xf32>
    %c0_197 = arith.constant 0 : index
    %c0_198 = arith.constant 0 : index
    %135 = vector.load %arg4[%c0_197, %c0_198] : memref<8x1xf32, #tpu.memory_space<vmem>>, vector<8x1xf32>
    %136 = vector.broadcast %135 : vector<8x1xf32> to vector<8x2048xf32>
    %137 = arith.addf %134, %136 : vector<8x2048xf32>
    %cst_199 = arith.constant 0.000000e+00 : f32
    %138 = vector.broadcast %cst_199 : f32 to vector<8x2048xf32>
    %139 = arith.maximumf %137, %138 : vector<8x2048xf32>
    %140 = vector.shape_cast %139 : vector<8x2048xf32> to vector<1x8x2048xf32>
    %c0_200 = arith.constant 0 : index
    %c0_201 = arith.constant 0 : index
    %c0_202 = arith.constant 0 : index
    %141 = vector.load %arg5[%c0_200, %c0_201, %c0_202] : memref<1x8x2048xf32, #tpu.memory_space<vmem>>, vector<1x8x2048xf32>
    tpu.vector_store %arg5[%c0_200, %c0_201, %c0_202], %140 {strides = array<i32>} : memref<1x8x2048xf32, #tpu.memory_space<vmem>>, vector<1x8x2048xf32>,
    return
  }
  func.func @transform_0(%arg0: i32) -> (i32, i32, i32, i32) {
    %c0_i32 = arith.constant 0 : i32
    %c0_i32_0 = arith.constant 0 : i32
    %c0_i32_1 = arith.constant 0 : i32
    %c0_i32_2 = arith.constant 0 : i32
    return %arg0, %c0_i32, %c0_i32_0, %c0_i32_1 : i32, i32, i32, i32
  }
  func.func @transform_1(%arg0: i32) -> (i32, i32, i32, i32) {
    %c0_i32 = arith.constant 0 : i32
    %c0_i32_0 = arith.constant 0 : i32
    %c0_i32_1 = arith.constant 0 : i32
    %c0_i32_2 = arith.constant 0 : i32
    return %arg0, %c0_i32, %c0_i32_0, %c0_i32_1 : i32, i32, i32, i32
  }
  func.func @transform_2(%arg0: i32) -> (i32, i32) {
    %c0_i32 = arith.constant 0 : i32
    %c0_i32_0 = arith.constant 0 : i32
    %c0_i32_1 = arith.constant 0 : i32
    return %c0_i32, %c0_i32_0 : i32, i32
  }
  func.func @transform_3(%arg0: i32) -> (i32, i32) {
    %c0_i32 = arith.constant 0 : i32
    %c0_i32_0 = arith.constant 0 : i32
    %c0_i32_1 = arith.constant 0 : i32
    return %c0_i32, %c0_i32_0 : i32, i32
  }
  func.func @transform_4(%arg0: i32) -> (i32, i32, i32) {
    %c0_i32 = arith.constant 0 : i32
    %c0_i32_0 = arith.constant 0 : i32
    %c0_i32_1 = arith.constant 0 : i32
    return %arg0, %c0_i32, %c0_i32_0 : i32, i32, i32
  }
}

</mosaic_0001>

<bundles_post_ra>
// kernel: up_forward.1
= control target key start
LH: loop header
LB: loop body
LE: loop exit
PB: predicated region body
PF: predicated region fallthrough
CT: control target
= control target key end

     0   :  { %s4969_s15 = smov 0   ;;  %s6324_s0 = inlined_call_operand.vmem [shape: f32[2,4,16,16], index: 0, kind: input, shape index: {}]   ;;  %s6325_s1 = inlined_call_operand.vmem [shape: f32[2,4,16,16], index: 1, kind: input, shape index: {}]   ;;  %s6326_s2 = inlined_call_operand.vmem [shape: f32[8,72], index: 2, kind: input, shape index: {}]   ;;  %s6327_s3 = inlined_call_operand.vmem [shape: f32[8,1], index: 3, kind: input, shape index: {}]   ;;  %s6328_s4 = inlined_call_operand.vmem [shape: f32[2,8,2048], index: 4, kind: output, shape index: {}]  }
   0x1 LB: > { %s4487_s16 = sadd.s32 4294967295, %s4929_s15   ;;  %p4491_p0 = scmp.ge.s32.totalorder %s4929_s15, 1  ;;  %s4929_s15 = sphi %s4969_s15, %s14_s15  }
   0x2   : > { %p172_p1 = scmp.lt.s32.totalorder %s4929_s15, 3 }
   0x4   : > { %p173_p2 = pnand %p4491_p0, %p172_p1 }
   0x5   : > { %p203_p3 = scmp.lt.s32.totalorder (!%p173_p2), %s4487_s16, 1  ;;  %s4931_s24 = smov (!%p173_p2), 1  }
   0x6   : > { %176 = sbr.rel (%p173_p2) target bundleno = 737 (0x2e1), region = 36  ;;  %s4933_s25 = smov (!%p173_p2), 127  }
   0x7   : > { %s4934_s28 = smov (!%p173_p2), 120   ;;  %s4935_s29 = smov (!%p173_p2), 126  }
   0x8   : > { %s4936_s30 = smov (!%p173_p2), 112   ;;  %s4937_s5 = smov (!%p173_p2), 104  }
   0x9   : > { %s4938_s6 = smov (!%p173_p2), 96   ;;  %s4939_s7 = smov (!%p173_p2), 88  }
   0xa   : > { %s4940_s8 = smov (!%p173_p2), 80   ;;  %s4941_s9 = smov (!%p173_p2), 72  }
   0xb   : > { %s6330_s16 = smov (!%p203_p3, %s4487_s16), 1  ;;  %vm246_vm0 = vcmask 1041409   ;;  %vm249_vm1 = vcmask 1042434   ;;  %vm252_vm2 = vcmask 1043459   ;;  %vm269_vm3 = vcmask 1045509   ;;  %s4942_s10 = smov 64  }
   0xc   : > { %s4644_s17 = sshll.u32 %s6330_s16, 6  ;;  %vm272_vm4 = vcmask 1046534   ;;  %vm275_vm5 = vcmask 1047559   ;;  %vm257_vm6 = vcmask 134152   ;;  %vm280_vm7 = vcmask 138252   ;;  %s4646_s13 = sshll.u32 %s6330_s16, 7 }
   0xd   : > { %s4983_s20 = scalar_lea.vmem %s6324_s0, %s4644_s17  ;;  %s4995_s23 = scalar_lea.vmem %s6325_s1, %s4644_s17  ;;  %vm909_vm8 = vcmask 1039360   ;;  %vm942_vm9 = vcmask 64512   ;;  %vm1623_vm10 = vcmask 1031168  }
   0xe   : > { %v356_v0 = vld [vmem:[%s4983_s20 + $0x3] sm:$0x1]  ;;  %v357_v1 = vld [vmem:[%s4983_s20 + $0x13] sm:$0x1]  ;;  %v319_v6 = vld [vmem:[%s4983_s20 + $0x2] sm:$0x1]  ;;  %s6260_s18 = scalar_lea.vmem %s6328_s4, %s4646_s13 }
   0xf   : > { %v358_v2 = vld [vmem:[%s4983_s20 + $0x23] sm:$0x1]  ;;  %v359_v3 = vld [vmem:[%s4983_s20 + $0x33] sm:$0x1]  ;;  %v364_v4 = vrot.slane %v357_v1, 7 }
  0x10   : > { %v366_v5 = vrot.slane %v358_v2, 6  ;;  %v368_v7 = vrot.slane %v359_v3, 5  ;;  %v320_v8 = vld [vmem:[%s4983_s20 + $0x12] sm:$0x1]  ;;  %v321_v9 = vld [vmem:[%s4983_s20 + $0x22] sm:$0x1] }
  0x11   : > { %v365_v10 = vsel %vm246_vm0, %v364_v4, %v356_v0  ;;  %v322_v11 = vld [vmem:[%s4983_s20 + $0x32] sm:$0x1]  ;;  %v327_v12 = vrot.slane %v320_v8, 7  ;;  %v329_v13 = vrot.slane %v321_v9, 6  ;;  %v282_v14 = vld [vmem:[%s4983_s20 + $0x1] sm:$0x1] }
  0x12   : > { %v367_v15 = vsel %vm249_vm1, %v366_v5, %v365_v10  ;;  %v331_v16 = vrot.slane %v322_v11, 5  ;;  %v283_v17 = vld [vmem:[%s4983_s20 + $0x11] sm:$0x1]  ;;  %v284_v18 = vld [vmem:[%s4983_s20 + $0x21] sm:$0x1] }
  0x13   : > { %v369_v19 = vsel %vm252_vm2, %v368_v7, %v367_v15  ;;  %v328_v20 = vsel %vm246_vm0, %v327_v12, %v319_v6  ;;  %v285_v21 = vld [vmem:[%s4983_s20 + $0x31] sm:$0x1]  ;;  %v290_v22 = vrot.slane %v283_v17, 7  ;;  %v292_v23 = vrot.slane %v284_v18, 6  ;;  %v374_v24 = vld [vmem:[%s4995_s23 + $0x3] sm:$0x1] }
  0x14   : > { %370 = vrot.lane.b32.xlu2 %v369_v19, %s4931_s24  ;;  %v330_v25 = vsel %vm249_vm1, %v329_v13, %v328_v20  ;;  %v294_v26 = vrot.slane %v285_v21, 5  ;;  %v375_v27 = vld [vmem:[%s4995_s23 + $0x13] sm:$0x1]  ;;  %v376_v28 = vld [vmem:[%s4995_s23 + $0x23] sm:$0x1]  ;;  %v382_v29 = vrot.slane %v374_v24, 4 }
  0x15   : > { %v332_v30 = vsel %vm252_vm2, %v331_v16, %v330_v25  ;;  %v291_v31 = vsel %vm246_vm0, %v290_v22, %v282_v14  ;;  %v377_v32 = vld [vmem:[%s4995_s23 + $0x33] sm:$0x1]  ;;  %v383_v33 = vrot.slane %v375_v27, 3  ;;  %v385_v34 = vrot.slane %v376_v28, 2  ;;  %v337_v35 = vld [vmem:[%s4995_s23 + $0x2] sm:$0x1] }
  0x16   : > { %333 = vrot.lane.b32.xlu1 %v332_v30, %s4931_s24  ;;  %v293_v36 = vsel %vm249_vm1, %v292_v23, %v291_v31  ;;  %v387_v37 = vrot.slane %v377_v32, 1  ;;  %v338_v38 = vld [vmem:[%s4995_s23 + $0x12] sm:$0x1]  ;;  %v339_v39 = vld [vmem:[%s4995_s23 + $0x22] sm:$0x1]  ;;  %v345_v40 = vrot.slane %v337_v35, 4 }
  0x17   : > { %v295_v41 = vsel %vm252_vm2, %v294_v26, %v293_v36  ;;  %v384_v42 = vsel %vm269_vm3, %v383_v33, %v382_v29  ;;  %v340_v43 = vld [vmem:[%s4995_s23 + $0x32] sm:$0x1]  ;;  %v346_v44 = vrot.slane %v338_v38, 3  ;;  %v348_v45 = vrot.slane %v339_v39, 2  ;;  %v300_v46 = vld [vmem:[%s4995_s23 + $0x1] sm:$0x1] }
  0x18   : > { %296 = vrot.lane.b32.xlu0 %v295_v41, %s4931_s24  ;;  %v386_v47 = vsel %vm272_vm4, %v385_v34, %v384_v42  ;;  %v350_v48 = vrot.slane %v340_v43, 1  ;;  %v301_v49 = vld [vmem:[%s4995_s23 + $0x11] sm:$0x1]  ;;  %v302_v50 = vld [vmem:[%s4995_s23 + $0x21] sm:$0x1]  ;;  %v308_v51 = vrot.slane %v300_v46, 4 }
  0x19   : > { %v388_v52 = vsel %vm275_vm5, %v387_v37, %v386_v47  ;;  %v347_v53 = vsel %vm269_vm3, %v346_v44, %v345_v40  ;;  %v303_v54 = vld [vmem:[%s4995_s23 + $0x31] sm:$0x1]  ;;  %v309_v55 = vrot.slane %v301_v49, 3  ;;  %v311_v56 = vrot.slane %v302_v50, 2  ;;  %v259_v57 = vld [vmem:[%s4995_s23] sm:$0x1] }
  0x1a   : > { %v349_v58 = vsel %vm272_vm4, %v348_v45, %v347_v53  ;;  %v313_v59 = vrot.slane %v303_v54, 1  ;;  %v260_v60 = vld [vmem:[%s4995_s23 + $0x10] sm:$0x1]  ;;  %v261_v61 = vld [vmem:[%s4995_s23 + $0x20] sm:$0x1]  ;;  %v267_v62 = vrot.slane %v259_v57, 4 }
  0x1b   : > { %v351_v63 = vsel %vm275_vm5, %v350_v48, %v349_v58  ;;  %v310_v0 = vsel %vm269_vm3, %v309_v55, %v308_v51  ;;  %v262_v1 = vld [vmem:[%s4995_s23 + $0x30] sm:$0x1]  ;;  %v268_v2 = vrot.slane %v260_v60, 3  ;;  %v271_v3 = vrot.slane %v261_v61, 2  ;;  %v237_v5 = vld [vmem:[%s4983_s20] sm:$0x1] }
  0x1c   : > { %389 = vrot.lane.b32.xlu2 %v388_v52, %s4931_s24  ;;  %v312_v4 = vsel %vm272_vm4, %v311_v56, %v310_v0  ;;  %v238_v6 = vld [vmem:[%s4983_s20 + $0x10] sm:$0x1]  ;;  %v239_v7 = vld [vmem:[%s4983_s20 + $0x20] sm:$0x1]  ;;  %v274_v12 = vrot.slane %v262_v1, 1 }
  0x1d   : > { %v314_v8 = vsel %vm275_vm5, %v313_v59, %v312_v4  ;;  %v270_v9 = vsel %vm269_vm3, %v268_v2, %v267_v62  ;;  %v240_v10 = vld [vmem:[%s4983_s20 + $0x30] sm:$0x1]  ;;  %v245_v11 = vrot.slane %v238_v6, 7  ;;  %v248_v13 = vrot.slane %v239_v7, 6  ;;  %v468_v14 = vld [vmem:[%s4983_s20 + $0x16] sm:$0x1] }
  0x1e   : > { %352 = vrot.lane.b32.xlu1 %v351_v63, %s4931_s24  ;;  %v467_v16 = vld [vmem:[%s4983_s20 + $0x6] sm:$0x1]  ;;  %v448_v18 = vld [vmem:[%s4995_s23 + $0x5] sm:$0x1]  ;;  %v273_v19 = vsel %vm272_vm4, %v271_v3, %v270_v9  ;;  %v251_v20 = vrot.slane %v240_v10, 5  ;;  %v475_v22 = vrot.slane %v468_v14, 7 }
  0x1f   : > { %v247_v15 = vsel %vm246_vm0, %v245_v11, %v237_v5  ;;  %v469_v17 = vld [vmem:[%s4983_s20 + $0x26] sm:$0x1]  ;;  %v470_v21 = vld [vmem:[%s4983_s20 + $0x36] sm:$0x1]  ;;  %v449_v23 = vld [vmem:[%s4995_s23 + $0x15] sm:$0x1]  ;;  %v276_v30 = vsel %vm275_vm5, %v274_v12, %v273_v19 }
  0x20   : > { %315 = vrot.lane.b32.xlu0 %v314_v8, %s4931_s24  ;;  %v450_v24 = vld [vmem:[%s4995_s23 + $0x25] sm:$0x1]  ;;  %v456_v25 = vrot.slane %v448_v18, 4  ;;  %v457_v26 = vrot.slane %v449_v23, 3  ;;  %v522_v27 = vld [vmem:[%s4995_s23 + $0x7] sm:$0x1]  ;;  %v250_v28 = vsel %vm249_vm1, %v248_v13, %v247_v15  ;;  %v476_v34 = vsel %vm246_vm0, %v475_v22, %v467_v16 }
  0x21   : > { %v523_v29 = vld [vmem:[%s4995_s23 + $0x17] sm:$0x1]  ;;  %v477_v31 = vrot.slane %v469_v17, 6  ;;  %v479_v32 = vrot.slane %v470_v21, 5  ;;  %v451_v33 = vld [vmem:[%s4995_s23 + $0x35] sm:$0x1]  ;;  %v253_v39 = vsel %vm252_vm2, %v251_v20, %v250_v28 }
  0x22   : > { %v459_v35 = vrot.slane %v450_v24, 2  ;;  %v524_v36 = vld [vmem:[%s4995_s23 + $0x27] sm:$0x1]  ;;  %v530_v37 = vrot.slane %v522_v27, 4  ;;  %v505_v38 = vld [vmem:[%s4983_s20 + $0x17] sm:$0x1]  ;;  %v458_v40 = vsel %vm269_vm3, %v457_v26, %v456_v25 }
  0x23   : > { %v5067_v41 = vld [vmem:[%s4995_s23 + $0x37] sm:$0x1]  ;;  %v531_v42 = vrot.slane %v523_v29, 3  ;;  %v506_v43 = vld [vmem:[%s4983_s20 + $0x27] sm:$0x1]  ;;  %v512_v44 = vrot.slane %v505_v38, 7  ;;  %v478_v48 = vsel %vm249_vm1, %v477_v31, %v476_v34 }
  0x24   : > { %v430_v45 = vld [vmem:[%s4983_s20 + $0x5] sm:$0x1]  ;;  %v431_v46 = vld [vmem:[%s4983_s20 + $0x15] sm:$0x1]  ;;  %v504_v49 = vld [vmem:[%s4983_s20 + $0x7] sm:$0x1]  ;;  %v460_v53 = vsel %vm272_vm4, %v459_v35, %v458_v40  ;;  %v480_v5 = vsel %vm252_vm2, %v479_v32, %v478_v48 }
  0x25   : > { %v432_v47 = vld [vmem:[%s4983_s20 + $0x25] sm:$0x1]  ;;  %v433_v50 = vld [vmem:[%s4983_s20 + $0x35] sm:$0x1]  ;;  %v438_v51 = vrot.slane %v431_v46, 7  ;;  %v461_v54 = vrot.slane %v451_v33, 1  ;;  %v532_v58 = vsel %vm269_vm3, %v531_v42, %v530_v37  ;;  %v513_v0 = vsel %vm246_vm0, %v512_v44, %v504_v49 }
  0x26   : > { %277 = vrot.lane.b32.xlu1 %v276_v30, %s4931_s24  ;;  %v440_v52 = vrot.slane %v432_v47, 6  ;;  %v533_v55 = vrot.slane %v524_v36, 2  ;;  %v507_v56 = vld [vmem:[%s4983_s20 + $0x37] sm:$0x1]  ;;  %v442_v57 = vrot.slane %v433_v50, 5  ;;  %v535_v59 = vrot.slane %v5067_v41, 1 }
  0x27   : > { %v514_v60 = vrot.slane %v506_v43, 6  ;;  %v439_v61 = vsel %vm246_vm0, %v438_v51, %v430_v45  ;;  %v579_v62 = vld [vmem:[%s4983_s20 + $0x19] sm:$0x1]  ;;  %v5085_v63 = vld [vmem:[%s4983_s20 + $0x29] sm:$0x1]  ;;  %v462_v10 = vsel %vm275_vm5, %v461_v54, %v460_v53  ;;  %v516_v12 = vrot.slane %v507_v56, 5 }
  0x28   : > { %254 = vrot.lane.b32.xlu0 %v253_v39, %s4931_s24  ;;  %v441_v1 = vsel %vm249_vm1, %v440_v52, %v439_v61  ;;  %v5090_v2 = vld [vmem:[%s4983_s20 + $0x39] sm:$0x1]  ;;  %v411_v3 = vld [vmem:[%s4995_s23 + $0x4] sm:$0x1]  ;;  %v412_v4 = vld [vmem:[%s4995_s23 + $0x14] sm:$0x1]  ;;  %v534_v11 = vsel %vm272_vm4, %v533_v55, %v532_v58 }
  0x29   : > { %v443_v6 = vsel %vm252_vm2, %v442_v57, %v441_v1  ;;  %v5097_v7 = vld [vmem:[%s4995_s23 + $0x24] sm:$0x1]  ;;  %v5100_v8 = vld [vmem:[%s4995_s23 + $0x34] sm:$0x1]  ;;  %v485_v9 = vld [vmem:[%s4995_s23 + $0x6] sm:$0x1]  ;;  %v515_v16 = vsel %vm249_vm1, %v514_v60, %v513_v0  ;;  %v536_v39 = vsel %vm275_vm5, %v535_v59, %v534_v11 }
  0x2a   : > { %444 = vrot.lane.b32.xlu2 %v443_v6, %s4931_s24  ;;  %v486_v13 = vld [vmem:[%s4995_s23 + $0x16] sm:$0x1]  ;;  %v487_v14 = vld [vmem:[%s4995_s23 + $0x26] sm:$0x1]  ;;  %v493_v15 = vrot.slane %v485_v9, 4  ;;  %v586_v17 = vrot.slane %v579_v62, 7  ;;  %v517_v40 = vsel %vm252_vm2, %v516_v12, %v515_v16 }
  0x2b   : > { %v488_v18 = vld [vmem:[%s4995_s23 + $0x36] sm:$0x1]  ;;  %v494_v19 = vrot.slane %v486_v13, 3  ;;  %v496_v20 = vrot.slane %v487_v14, 2  ;;  %v578_v21 = vld [vmem:[%s4983_s20 + $0x9] sm:$0x1] }
  0x2c   : > { %v588_v22 = vrot.slane %v5085_v63, 6  ;;  %v590_v23 = vrot.slane %v5090_v2, 5  ;;  %v419_v24 = vrot.slane %v411_v3, 4  ;;  %v498_v25 = vrot.slane %v488_v18, 1  ;;  %v633_v30 = vld [vmem:[%s4995_s23 + $0xa] sm:$0x1] }
  0x2d   : > { %v420_v26 = vrot.slane %v412_v4, 3  ;;  %v422_v27 = vrot.slane %v5097_v7, 2  ;;  %v424_v28 = vrot.slane %v5100_v8, 1  ;;  %v495_v29 = vsel %vm269_vm3, %v494_v19, %v493_v15  ;;  %v634_v32 = vld [vmem:[%s4995_s23 + $0x1a] sm:$0x1] }
  0x2e   : > { %481 = vrot.lane.b32.xlu1 %v480_v5, %s4931_s24  ;;  %v497_v31 = vsel %vm272_vm4, %v496_v20, %v495_v29  ;;  %v635_v33 = vld [vmem:[%s4995_s23 + $0x2a] sm:$0x1]  ;;  %v5123_v34 = vld [vmem:[%s4995_s23 + $0x3a] sm:$0x1]  ;;  %v587_v41 = vsel %vm246_vm0, %v586_v17, %v578_v21  ;;  %v393_v42 = vld [vmem:[%s4983_s20 + $0x4] sm:$0x1] }
  0x2f   : > { %v499_v35 = vsel %vm275_vm5, %v498_v25, %v497_v31  ;;  %v616_v36 = vld [vmem:[%s4983_s20 + $0x1a] sm:$0x1]  ;;  %v5128_v37 = vld [vmem:[%s4983_s20 + $0x2a] sm:$0x1]  ;;  %v394_v43 = vld [vmem:[%s4983_s20 + $0x14] sm:$0x1]  ;;  %v421_v54 = vsel %vm269_vm3, %v420_v26, %v419_v24  ;;  %v589_v0 = vsel %vm249_vm1, %v588_v22, %v587_v41 }
  0x30   : > { %463 = vrot.lane.b32.xlu0 %v462_v10, %s4931_s24  ;;  %v5131_v38 = vld [vmem:[%s4983_s20 + $0x3a] sm:$0x1]  ;;  %v395_v44 = vld [vmem:[%s4983_s20 + $0x24] sm:$0x1]  ;;  %v641_v45 = vrot.slane %v633_v30, 4  ;;  %v642_v46 = vrot.slane %v634_v32, 3  ;;  %v423_v4 = vsel %vm272_vm4, %v422_v27, %v421_v54  ;;  %v591_v16 = vsel %vm252_vm2, %v590_v23, %v589_v0 }
  0x31   : > { %v396_v47 = vld [vmem:[%s4983_s20 + $0x34] sm:$0x1]  ;;  %v401_v48 = vrot.slane %v394_v43, 7  ;;  %v403_v49 = vrot.slane %v395_v44, 6  ;;  %v644_v50 = vrot.slane %v635_v33, 2  ;;  %v646_v51 = vrot.slane %v5123_v34, 1 }
  0x32   : > { %500 = vrot.lane.b32.xlu2 %v499_v35, %s4931_s24  ;;  %v623_v52 = vrot.slane %v616_v36, 7  ;;  %v625_v53 = vrot.slane %v5128_v37, 6  ;;  %v627_v55 = vrot.slane %v5131_v38, 5  ;;  %v405_v57 = vrot.slane %v396_v47, 5  ;;  %v5147_v58 = vld [vmem:[%s4983_s20 + $0x18] sm:$0x1] }
  0x33   : > { %v402_v56 = vsel %vm246_vm0, %v401_v48, %v393_v42  ;;  %v5150_v59 = vld [vmem:[%s4983_s20 + $0x28] sm:$0x1]  ;;  %v5155_v61 = vld [vmem:[%s4983_s20 + $0x38] sm:$0x1]  ;;  %v5158_v62 = vld [vmem:[%s4995_s23 + $0xb] sm:$0x1]  ;;  %v643_v5 = vsel %vm269_vm3, %v642_v46, %v641_v45  ;;  %v425_v23 = vsel %vm275_vm5, %v424_v28, %v423_v4 }
  0x34   : > { %v404_v60 = vsel %vm249_vm1, %v403_v49, %v402_v56  ;;  %v5161_v63 = vld [vmem:[%s4995_s23 + $0x1b] sm:$0x1]  ;;  %v5165_v1 = vld [vmem:[%s4995_s23 + $0x2b] sm:$0x1]  ;;  %v596_v3 = vld [vmem:[%s4995_s23 + $0x9] sm:$0x1]  ;;  %v645_v27 = vsel %vm272_vm4, %v644_v50, %v643_v5 }
  0x35   : > { %v5168_v2 = vld [vmem:[%s4995_s23 + $0x3b] sm:$0x1]  ;;  %v549_v6 = vrot.slane %v5147_v58, 7  ;;  %v597_v7 = vld [vmem:[%s4995_s23 + $0x19] sm:$0x1]  ;;  %v604_v10 = vrot.slane %v596_v3, 4  ;;  %v406_v12 = vsel %vm252_vm2, %v405_v57, %v404_v60  ;;  %v647_v50 = vsel %vm275_vm5, %v646_v51, %v645_v27 }
  0x36   : > { %537 = vrot.lane.b32.xlu1 %v536_v39, %s4931_s24  ;;  %v598_v9 = vld [vmem:[%s4995_s23 + $0x29] sm:$0x1]  ;;  %v615_v11 = vld [vmem:[%s4983_s20 + $0xa] sm:$0x1]  ;;  %v551_v13 = vrot.slane %v5150_v59, 6  ;;  %v553_v14 = vrot.slane %v5155_v61, 5 }
  0x37   : > { %v605_v15 = vrot.slane %v597_v7, 3  ;;  %v678_v17 = vrot.slane %v5158_v62, 4  ;;  %v599_v18 = vld [vmem:[%s4995_s23 + $0x39] sm:$0x1]  ;;  %v607_v19 = vrot.slane %v598_v9, 2  ;;  %v679_v21 = vrot.slane %v5161_v63, 3 }
  0x38   : > { %518 = vrot.lane.b32.xlu0 %v517_v40, %s4931_s24  ;;  %v5185_v20 = vld [vmem:[%s4995_s23 + $0xd] sm:$0x1]  ;;  %v681_v22 = vrot.slane %v5165_v1, 2  ;;  %v683_v24 = vrot.slane %v5168_v2, 1  ;;  %v5192_v26 = vld [vmem:[%s4995_s23 + $0x1d] sm:$0x1]  ;;  %v624_v29 = vsel %vm246_vm0, %v623_v52, %v615_v11 }
  0x39   : > { %v606_v25 = vsel %vm269_vm3, %v605_v15, %v604_v10  ;;  %v726_v30 = vld [vmem:[%s4983_s20 + $0xd] sm:$0x1]  ;;  %v727_v31 = vld [vmem:[%s4983_s20 + $0x1d] sm:$0x1]  ;;  %v541_v33 = vld [vmem:[%s4983_s20 + $0x8] sm:$0x1]  ;;  %v626_v44 = vsel %vm249_vm1, %v625_v53, %v624_v29  ;;  %v680_v38 = vsel %vm269_vm3, %v679_v21, %v678_v17 }
  0x3a   : > { %407 = vrot.lane.b32.xlu2 %v406_v12, %s4931_s24  ;;  %v728_v32 = vld [vmem:[%s4983_s20 + $0x2d] sm:$0x1]  ;;  %v609_v35 = vrot.slane %v599_v18, 1  ;;  %v752_v36 = vrot.slane %v5185_v20, 4  ;;  %v729_v8 = vld [vmem:[%s4983_s20 + $0x3d] sm:$0x1]  ;;  %v608_v39 = vsel %vm272_vm4, %v607_v19, %v606_v25  ;;  %v628_v34 = vsel %vm252_vm2, %v627_v55, %v626_v44 }
  0x3b   : > { %v734_v37 = vrot.slane %v727_v31, 7  ;;  %v736_v28 = vrot.slane %v728_v32, 6  ;;  %v753_v40 = vrot.slane %v5192_v26, 3  ;;  %v738_v41 = vrot.slane %v729_v8, 5  ;;  %v653_v42 = vld [vmem:[%s4983_s20 + $0x1b] sm:$0x1] }
  0x3c   : > { %v654_v43 = vld [vmem:[%s4983_s20 + $0x2b] sm:$0x1]  ;;  %v655_v47 = vld [vmem:[%s4983_s20 + $0x3b] sm:$0x1]  ;;  %v660_v48 = vrot.slane %v653_v42, 7  ;;  %v610_v57 = vsel %vm275_vm5, %v609_v35, %v608_v39  ;;  %v550_v51 = vsel %vm246_vm0, %v549_v6, %v541_v33 }
  0x3d   : > { %v735_v45 = vsel %vm246_vm0, %v734_v37, %v726_v30  ;;  %v652_v46 = vld [vmem:[%s4983_s20 + $0xb] sm:$0x1]  ;;  %v662_v49 = vrot.slane %v654_v43, 6  ;;  %v800_v54 = vld [vmem:[%s4983_s20 + $0xf] sm:$0x1]  ;;  %v664_v55 = vrot.slane %v655_v47, 5  ;;  %v552_v37 = vsel %vm249_vm1, %v551_v13, %v550_v51 }
  0x3e   : > { %592 = vrot.lane.b32.xlu1 %v591_v16, %s4931_s24  ;;  %v737_v52 = vsel %vm249_vm1, %v736_v28, %v735_v45  ;;  %v801_v56 = vld [vmem:[%s4983_s20 + $0x1f] sm:$0x1]  ;;  %v802_v53 = vld [vmem:[%s4983_s20 + $0x2f] sm:$0x1]  ;;  %v781_v0 = vld [vmem:[%s4995_s23 + $0xe] sm:$0x1]  ;;  %v661_v9 = vsel %vm246_vm0, %v660_v48, %v652_v46  ;;  %v682_v45 = vsel %vm272_vm4, %v681_v22, %v680_v38  ;;  %v554_v1 = vsel %vm252_vm2, %v553_v14, %v552_v37 }
  0x3f   : > { %v5225_v58 = vsel %vm252_vm2, %v738_v41, %v737_v52  ;;  %v803_v60 = vld [vmem:[%s4983_s20 + $0x3f] sm:$0x1]  ;;  %v808_v62 = vrot.slane %v801_v56, 7  ;;  %v810_v63 = vrot.slane %v802_v53, 6  ;;  %v782_v4 = vld [vmem:[%s4995_s23 + $0x1e] sm:$0x1]  ;;  %v663_v30 = vsel %vm249_vm1, %v662_v49, %v661_v9 }
  0x40   : > { %426 = vrot.lane.b32.xlu0 %v425_v23, %s4931_s24  ;;  %v812_v3 = vrot.slane %v803_v60, 5  ;;  %v783_v5 = vld [vmem:[%s4995_s23 + $0x2e] sm:$0x1]  ;;  %v789_v7 = vrot.slane %v781_v0, 4  ;;  %v784_v11 = vld [vmem:[%s4995_s23 + $0x3e] sm:$0x1]  ;;  %v665_v48 = vsel %vm252_vm2, %v664_v55, %v663_v30  ;;  %v684_v14 = vsel %vm275_vm5, %v683_v24, %v682_v45 }
  0x41   : > { %v809_v10 = vsel %vm246_vm0, %v808_v62, %v800_v54  ;;  %v790_v12 = vrot.slane %v782_v4, 3  ;;  %v792_v15 = vrot.slane %v783_v5, 2  ;;  %v559_v16 = vld [vmem:[%s4995_s23 + $0x8] sm:$0x1]  ;;  %v794_v18 = vrot.slane %v784_v11, 1 }
  0x42   : > { %611 = vrot.lane.b32.xlu2 %v610_v57, %s4931_s24  ;;  %v811_v6 = vsel %vm249_vm1, %v810_v63, %v809_v10  ;;  %v560_v19 = vld [vmem:[%s4995_s23 + $0x18] sm:$0x1]  ;;  %v561_v25 = vld [vmem:[%s4995_s23 + $0x28] sm:$0x1]  ;;  %v567_v29 = vrot.slane %v559_v16, 4  ;;  %v4932_v63 = vmov 0.0   ;;  %v754_v10 = vsel %vm269_vm3, %v753_v40, %v752_v36 }
  0x43   : > { %v5245_v23 = vsel %vm252_vm2, %v812_v3, %v811_v6  ;;  %v791_v27 = vsel %vm269_vm3, %v790_v12, %v789_v7  ;;  %v568_v17 = vrot.slane %v560_v19, 3  ;;  %v707_v21 = vld [vmem:[%s4995_s23 + $0xc] sm:$0x1]  ;;  %v570_v32 = vrot.slane %v561_v25, 2  ;;  %v708_v33 = vld [vmem:[%s4995_s23 + $0x1c] sm:$0x1] }
  0x44   : > { %v793_v31 = vsel %vm272_vm4, %v792_v15, %v791_v27  ;;  %v709_v35 = vld [vmem:[%s4995_s23 + $0x2c] sm:$0x1]  ;;  %v715_v8 = vrot.slane %v707_v21, 4  ;;  %v746_v28 = vld [vmem:[%s4995_s23 + $0x2d] sm:$0x1]  ;;  %v716_v42 = vrot.slane %v708_v33, 3 }
  0x45   : > { %v5259_v39 = vsel %vm275_vm5, %v794_v18, %v793_v31  ;;  %v710_v41 = vld [vmem:[%s4995_s23 + $0x3c] sm:$0x1]  ;;  %v718_v43 = vrot.slane %v709_v35, 2  ;;  %v689_v44 = vld [vmem:[%s4983_s20 + $0xc] sm:$0x1]  ;;  %v569_v22 = vsel %vm269_vm3, %v568_v17, %v567_v29  ;;  %222 = vst [vmem:[#allocation2 + $0x20] sm:$0xff] %v4932_v63 }
  0x46   : > { %648 = vrot.lane.b32.xlu1 %v647_v50, %s4931_s24  ;;  %v562_v59 = vld [vmem:[%s4995_s23 + $0x38] sm:$0x1]  ;;  %v720_v46 = vrot.slane %v710_v41, 1  ;;  %v690_v13 = vld [vmem:[%s4983_s20 + $0x1c] sm:$0x1]  ;;  %v717_v49 = vsel %vm269_vm3, %v716_v42, %v715_v8  ;;  %218 = vst [vmem:[#allocation2] sm:$0xff] %v4932_v63  ;;  %v571_v12 = vsel %vm272_vm4, %v570_v32, %v569_v22 }
  0x47   : > { %v691_v47 = vld [vmem:[%s4983_s20 + $0x2c] sm:$0x1]  ;;  %v692_v50 = vld [vmem:[%s4983_s20 + $0x3c] sm:$0x1]  ;;  %v697_v52 = vrot.slane %v690_v13, 7  ;;  %v719_v53 = vsel %vm272_vm4, %v718_v43, %v717_v49  ;;  %v755_v5 = vrot.slane %v746_v28, 2 }
  0x48   : > { %629 = vrot.lane.b32.xlu0 %v628_v34, %s4931_s24  ;;  %v699_v54 = vrot.slane %v691_v47, 6  ;;  %v763_v56 = vld [vmem:[%s4983_s20 + $0xe] sm:$0x1]  ;;  %v701_v57 = vrot.slane %v692_v50, 5  ;;  %v764_v60 = vld [vmem:[%s4983_s20 + $0x1e] sm:$0x1]  ;;  %v721_v0 = vsel %vm275_vm5, %v720_v46, %v719_v53 }
  0x49   : > { %v765_v62 = vld [vmem:[%s4983_s20 + $0x2e] sm:$0x1]  ;;  %v698_v34 = vsel %vm246_vm0, %v697_v52, %v689_v44  ;;  %v766_v51 = vld [vmem:[%s4983_s20 + $0x3e] sm:$0x1]  ;;  %v771_v3 = vrot.slane %v764_v60, 7  ;;  %219 = vst [vmem:[#allocation2 + $0x8] sm:$0xff] %v4932_v63  ;;  %v756_v16 = vsel %vm272_vm4, %v755_v5, %v754_v10 }
  0x4a   : > { %v773_v61 = vrot.slane %v765_v62, 6  ;;  %v747_v4 = vld [vmem:[%s4995_s23 + $0x3d] sm:$0x1]  ;;  %666 = vrot.lane.b32.xlu2 %v665_v48, %s4931_s24  ;;  %v700_v7 = vsel %vm249_vm1, %v699_v54, %v698_v34  ;;  %v775_v9 = vrot.slane %v766_v51, 5  ;;  %v572_v2 = vrot.slane %v562_v59, 1  ;;  %220 = vst [vmem:[#allocation2 + $0x10] sm:$0xff] %v4932_v63 }
  0x4b   : > { %v702_v24 = vsel %vm252_vm2, %v701_v57, %v700_v7  ;;  %v772_v11 = vsel %vm246_vm0, %v771_v3, %v763_v56  ;;  %221 = vst [vmem:[#allocation2 + $0x18] sm:$0xff] %v4932_v63  ;;  %v757_v20 = vrot.slane %v747_v4, 1  ;;  %v818_v36 = vld [vmem:[%s4995_s23 + $0xf] sm:$0x1]  ;;  %v819_v40 = vld [vmem:[%s4995_s23 + $0x1f] sm:$0x1] }
  0x4c   : > { %v774_v15 = vsel %vm249_vm1, %v773_v61, %v772_v11  ;;  %223 = vst [vmem:[#allocation2 + $0x28] sm:$0xff] %v4932_v63  ;;  %v820_v38 = vld [vmem:[%s4995_s23 + $0x2f] sm:$0x1]  ;;  %v821_v55 = vld [vmem:[%s4995_s23 + $0x3f] sm:$0x1]  ;;  %v826_v6 = vrot.slane %v818_v36, 4  ;;  %v573_v18 = vsel %vm275_vm5, %v572_v2, %v571_v12 }
  0x4d   : > { %v776_v26 = vsel %vm252_vm2, %v775_v9, %v774_v15  ;;  %224 = vst [vmem:[#allocation2 + $0x30] sm:$0xff] %v4932_v63  ;;  %v827_v19 = vrot.slane %v819_v40, 3  ;;  %v829_v25 = vrot.slane %v820_v38, 2  ;;  %v831_v27 = vrot.slane %v821_v55, 1  ;;  %v5358_v41 = vld [vmem:[%s6326_s2] sm:$0xff] }
  0x4e   : > { %555 = vrot.lane.b32.xlu1 %v554_v1, %s4931_s24  ;;  %225 = vst [vmem:[#allocation2 + $0x38] sm:$0xff] %v4932_v63  ;;  %v758_v29 = vsel %vm275_vm5, %v757_v20, %v756_v16 }
  0x4f   : > { %226 = vst [vmem:[#allocation2 + $0x40] sm:$0xff] %v4932_v63  ;;  %v828_v17 = vsel %vm269_vm3, %v827_v19, %v826_v6 }
  0x50   : > { %685 = vrot.lane.b32.xlu0 %v684_v14, %s4931_s24  ;;  %227 = vst [vmem:[#allocation2 + $0x48] sm:$0xff] %v4932_v63  ;;  %v830_v21 = vsel %vm272_vm4, %v829_v25, %v828_v17 }
  0x51   : > { %228 = vst [vmem:[#allocation2 + $0x50] sm:$0xff] %v4932_v63  ;;  %v832_v30 = vsel %vm275_vm5, %v831_v27, %v830_v21 }
  0x52   : > { %574 = vrot.lane.b32.xlu2 %v573_v18, %s4931_s24  ;;  %229 = vst [vmem:[#allocation2 + $0x58] sm:$0xff] %v4932_v63 }
  0x53   : > { %230 = vst [vmem:[#allocation2 + $0x60] sm:$0xff] %v4932_v63 }
  0x54   : > { %231 = vst [vmem:[#allocation2 + $0x68] sm:$0xff] %v4932_v63 }
  0x55   : > { %232 = vst [vmem:[#allocation2 + $0x70] sm:$0xff] %v4932_v63 }
  0x56   : > { %759 = vrot.lane.b32.xlu1 %v758_v29, %s4931_s24  ;;  %233 = vst [vmem:[#allocation2 + $0x78] sm:$0xff] %v4932_v63 }
  0x57   : > { %234 = vst [vmem:[#allocation2 + $0x80] sm:$0xff] %v4932_v63 }
  0x58   : > { %740 = vrot.lane.b32.xlu0 %v5225_v58, %s4931_s24 }
  0x5a   : > { %777 = vrot.lane.b32.xlu2 %v776_v26, %s4931_s24 }
  0x5e   : > { %814 = vrot.lane.b32.xlu1 %v5245_v23, %s4931_s24 }
  0x60   : > { %796 = vrot.lane.b32.xlu0 %v5259_v39, %s4931_s24 }
  0x62   : > { %833 = vrot.lane.b32.xlu2 %v832_v30, %s4931_s24 }
  0x66   : > { %722 = vrot.lane.b32.xlu1 %v721_v0, %s4931_s24 }
  0x68   : > { %703 = vrot.lane.b32.xlu0 %v702_v24, %s4931_s24 }
  0x6e   : > { %v371_v58 = vpop.permute.xlu2 %370  ;;  %856 = vrot.lane.b32.xlu1 %v5358_v41, %s4934_s28 }
  0x6f   : > { %373 = vst.msk [vmem:[#allocation2 + $0x20] sm:$0xf] %vm257_vm6, %v371_v58 }
  0x76   : > { %v390_v31 = vpop.permute.xlu2 %389 }
  0x77   : > { %392 = vst.msk [vmem:[#allocation2 + $0x20] sm:$0xf0] %vm280_vm7, %v390_v31 }
  0x7e   : > { %v5343_v32 = vld [vmem:[#allocation2 + $0x20] sm:$0xff] }
  0x7f   : > { %v4673_v23 = vpack.i.bf16 0.0, %v5343_v32 }
  0x81   : > { %4674 = vrot.lane.b32.xlu0 %v4673_v23, %s4933_s25 }
  0x84   : > { %v445_v33 = vpop.permute.xlu2 %444 }
  0x85   : > { %447 = vst.msk [vmem:[#allocation2 + $0x30] sm:$0xf] %vm257_vm6, %v445_v33 }
  0x88   : > { %v334_v35 = vpop.permute.xlu1 %333 }
  0x89   : > { %336 = vst.msk [vmem:[#allocation2 + $0x18] sm:$0xf] %vm257_vm6, %v334_v35 }
  0x8a   : > { %v297_v8 = vpop.permute.xlu0 %296 }
  0x8b   : > { %299 = vst.msk [vmem:[#allocation2 + $0x10] sm:$0xf] %vm257_vm6, %v297_v8 }
  0x8c   : > { %v501_v37 = vpop.permute.xlu2 %500 }
  0x8d   : > { %503 = vst.msk [vmem:[#allocation2 + $0x38] sm:$0xf0] %vm280_vm7, %v501_v37 }
  0x90   : > { %v353_v28 = vpop.permute.xlu1 %352 }
  0x91   : > { %355 = vst.msk [vmem:[#allocation2 + $0x18] sm:$0xf0] %vm280_vm7, %v353_v28 }
  0x92   : > { %v316_v39 = vpop.permute.xlu0 %315 }
  0x93   : > { %318 = vst.msk [vmem:[#allocation2 + $0x10] sm:$0xf0] %vm280_vm7, %v316_v39 }
  0x94   : > { %v408_v42 = vpop.permute.xlu2 %407 }
  0x95   : > { %410 = vst.msk [vmem:[#allocation2 + $0x28] sm:$0xf] %vm257_vm6, %v408_v42 }
  0x98   : > { %v278_v43 = vpop.permute.xlu1 %277  ;;  %v5362_v44 = vld [vmem:[#allocation2 + $0x18] sm:$0xff] }
  0x99   : > { %281 = vst.msk [vmem:[#allocation2 + $0x8] sm:$0xf0] %vm280_vm7, %v278_v43 }
  0x9a   : > { %v255_v45 = vpop.permute.xlu0 %254  ;;  %v5365_v59 = vld [vmem:[#allocation2 + $0x10] sm:$0xff] }
  0x9b   : > { %258 = vst.msk [vmem:[#allocation2 + $0x8] sm:$0xf] %vm257_vm6, %v255_v45  ;;  %v5370_v46 = vpack.i.bf16 %v5362_v44, %v5365_v59 }
  0x9c   : > { %v612_v13 = vpop.permute.xlu2 %611 }
  0x9d   : > { %4669 = vrot.lane.b32.xlu2 %v5370_v46, %s4933_s25  ;;  %614 = vst.msk [vmem:[#allocation2 + $0x50] sm:$0xf0] %vm280_vm7, %v612_v13 }
  0xa0   : > { %v482_v47 = vpop.permute.xlu1 %481 }
  0xa1   : > { %484 = vst.msk [vmem:[#allocation2 + $0x38] sm:$0xf] %vm257_vm6, %v482_v47 }
  0xa2   : > { %v464_v48 = vpop.permute.xlu0 %463  ;;  %v5379_v54 = vld [vmem:[#allocation2 + $0x8] sm:$0xff] }
  0xa3   : > { %466 = vst.msk [vmem:[#allocation2 + $0x30] sm:$0xf0] %vm280_vm7, %v464_v48 }
  0xa4   : > { %v667_v49 = vpop.permute.xlu2 %666 }
  0xa5   : > { %669 = vst.msk [vmem:[#allocation2 + $0x60] sm:$0xf] %vm257_vm6, %v667_v49 }
  0xa8   : > { %v538_v50 = vpop.permute.xlu1 %537  ;;  %v5389_v60 = vld [vmem:[#allocation2 + $0x38] sm:$0xff] }
  0xa9   : > { %540 = vst.msk [vmem:[#allocation2 + $0x40] sm:$0xf0] %vm280_vm7, %v538_v50  ;;  %v4758_v28 = vpack.i.bf16 %v5389_v60, %v5365_v59 }
  0xaa   : > { %v519_v52 = vpop.permute.xlu0 %518  ;;  %v5381_v56 = vld [vmem:[#allocation2 + $0x30] sm:$0xff] }
  0xab   : > { %521 = vst.msk [vmem:[#allocation2 + $0x40] sm:$0xf] %vm257_vm6, %v519_v52  ;;  %v4678_v1 = vpack.i.bf16 %v5381_v56, %v5379_v54 }
  0xac   : > { %v575_v22 = vpop.permute.xlu2 %574 }
  0xad   : > { %4679 = vrot.lane.b32.xlu2 %v4678_v1, %s4933_s25  ;;  %577 = vst.msk [vmem:[#allocation2 + $0x48] sm:$0xf0] %vm280_vm7, %v575_v22 }
  0xb0   : > { %v593_v53 = vpop.permute.xlu1 %592 }
  0xb1   : > { %595 = vst.msk [vmem:[#allocation2 + $0x50] sm:$0xf] %vm257_vm6, %v593_v53 }
  0xb2   : > { %v427_v57 = vpop.permute.xlu0 %426  ;;  %v5391_v62 = vld [vmem:[#allocation2 + $0x40] sm:$0xff] }
  0xb3   : > { %429 = vst.msk [vmem:[#allocation2 + $0x28] sm:$0xf0] %vm280_vm7, %v427_v57  ;;  %v4683_v0 = vpack.i.bf16 %v5391_v62, %v5389_v60 }
  0xb4   : > { %v778_v34 = vpop.permute.xlu2 %777 }
  0xb5   : > { %4684 = vrot.lane.b32.xlu0 %v4683_v0, %s4933_s25  ;;  %780 = vst.msk [vmem:[#allocation2 + $0x78] sm:$0xf] %vm257_vm6, %v778_v34 }
  0xb8   : > { %v649_v51 = vpop.permute.xlu1 %648  ;;  %v5398_v3 = vld [vmem:[#allocation2 + $0x50] sm:$0xff] }
  0xb9   : > { %651 = vst.msk [vmem:[#allocation2 + $0x58] sm:$0xf0] %vm280_vm7, %v649_v51 }
  0xba   : > { %v630_v61 = vpop.permute.xlu0 %629  ;;  %v5401_v14 = vld [vmem:[#allocation2 + $0x28] sm:$0xff] }
  0xbb   : > { %632 = vst.msk [vmem:[#allocation2 + $0x58] sm:$0xf] %vm257_vm6, %v630_v61  ;;  %v4688_v4 = vpack.i.bf16 %v5398_v3, %v5401_v14  ;;  %v4753_v31 = vpack.i.bf16 %v5379_v54, %v5401_v14 }
  0xbc   : > { %v834_v5 = vpop.permute.xlu2 %833 }
  0xbd   : > { %4689 = vrot.lane.b32.xlu1 %v4688_v4, %s4933_s25  ;;  %836 = vst.msk [vmem:[#allocation2 + $0x80] sm:$0xf0] %vm280_vm7, %v834_v5 }
  0xc0   : > { %v556_v7 = vpop.permute.xlu1 %555 }
  0xc1   : > { %558 = vst.msk [vmem:[#allocation2 + $0x48] sm:$0xf] %vm257_vm6, %v556_v7 }
  0xc2   : > { %v686_v9 = vpop.permute.xlu0 %685  ;;  %v5411_v24 = vld [vmem:[#allocation2 + $0x58] sm:$0xff] }
  0xc3   : > { %688 = vst.msk [vmem:[#allocation2 + $0x60] sm:$0xf0] %vm280_vm7, %v686_v9  ;;  %v4768_v43 = vpack.i.bf16 %v5411_v24, %v5381_v56 }
  0xc8   : > { %v760_v10 = vpop.permute.xlu1 %759  ;;  %v5420_v26 = vld [vmem:[#allocation2 + $0x48] sm:$0xff] }
  0xc9   : > { %762 = vst.msk [vmem:[#allocation2 + $0x70] sm:$0xf0] %vm280_vm7, %v760_v10  ;;  %v4763_v33 = vpack.i.bf16 %v5420_v26, %v5391_v62  ;;  %v4833_v10 = vpack.i.bf16 %v5365_v59, %v5381_v56 }
  0xca   : > { %v741_v2 = vpop.permute.xlu0 %740  ;;  %v5413_v11 = vld [vmem:[#allocation2 + $0x60] sm:$0xff] }
  0xcb   : > { %743 = vst.msk [vmem:[#allocation2 + $0x70] sm:$0xf] %vm257_vm6, %v741_v2  ;;  %v4693_v12 = vpack.i.bf16 %v5413_v11, %v5411_v24  ;;  %v4828_v2 = vpack.i.bf16 %v5401_v14, %v5343_v32 }
  0xcd   : > { %4694 = vrot.lane.b32.xlu2 %v4693_v12, %s4933_s25 }
  0xd0   : > { %v815_v15 = vpop.permute.xlu1 %814 }
  0xd1   : > { %817 = vst.msk [vmem:[#allocation2 + $0x80] sm:$0xf] %vm257_vm6, %v815_v15  ;;  %v4838_v15 = vpack.i.bf16 %v5391_v62, %v5362_v44 }
  0xd2   : > { %v797_v20 = vpop.permute.xlu0 %796  ;;  %v5422_v36 = vld [vmem:[#allocation2 + $0x70] sm:$0xff] }
  0xd3   : > { %799 = vst.msk [vmem:[#allocation2 + $0x78] sm:$0xf0] %vm280_vm7, %v797_v20  ;;  %v4698_v40 = vpack.i.bf16 %v5422_v36, %v5420_v26  ;;  %v4848_v20 = vpack.i.bf16 %v5413_v11, %v5389_v60 }
  0xd5   : > { %4699 = vrot.lane.b32.xlu0 %v4698_v40, %s4933_s25 }
  0xd8   : > { %v723_v16 = vpop.permute.xlu1 %722  ;;  %v5428_v38 = vld [vmem:[#allocation2 + $0x80] sm:$0xff] }
  0xd9   : > { %725 = vst.msk [vmem:[#allocation2 + $0x68] sm:$0xf0] %vm280_vm7, %v723_v16  ;;  %v4783_v47 = vpack.i.bf16 0.0, %v5428_v38 }
  0xda   : > { %v704_v55 = vpop.permute.xlu0 %703  ;;  %v5431_v6 = vld [vmem:[#allocation2 + $0x78] sm:$0xff] }
  0xdb   : > { %706 = vst.msk [vmem:[#allocation2 + $0x68] sm:$0xf] %vm257_vm6, %v704_v55  ;;  %v4703_v18 = vpack.i.bf16 %v5428_v38, %v5431_v6  ;;  %v4778_v45 = vpack.i.bf16 %v5431_v6, %v5398_v3 }
  0xdd   : > { %4709 = vrot.lane.b32.xlu0 %v5370_v46, %s4935_s29  ;;  %4704 = vrot.lane.b32.xlu1 %v4703_v18, %s4933_s25 }
  0xe0   : > { %v5485_v46 = vpop.permute.xlu1 %856 }
  0xe2   : > { %v5439_v19 = vld [vmem:[#allocation2 + $0x68] sm:$0xff] }
  0xe3   : > { %901 = vrot.lane.b32.xlu2 %v5439_v19, %s4933_s25  ;;  %v4773_v13 = vpack.i.bf16 %v5439_v19, %v5413_v11 }
  0xe5   : > { %4719 = vrot.lane.b32.xlu0 %v4678_v1, %s4935_s29  ;;  %4714 = vrot.lane.b32.xlu1 %v4673_v23, %s4935_s29  ;;  %v4748_v23 = vpack.i.bf16 %v5343_v32, %v5362_v44 }
  0xeb   : > { %1587 = vrot.lane.b32.xlu2 %v5358_v41, %s4936_s30 }
  0xed   : > { %4734 = vrot.lane.b32.xlu0 %v4693_v12, %s4935_s29  ;;  %4724 = vrot.lane.b32.xlu1 %v4683_v0, %s4935_s29  ;;  %v4843_v12 = vpack.i.bf16 %v5398_v3, %v5420_v26 }
  0xf3   : > { %4729 = vrot.lane.b32.xlu2 %v4688_v4, %s4935_s29  ;;  %v5451_v25 = vpop.permute.xlu0 %4674 }
  0xf4   : > { %v4676_v27 = vunpack.i.l.bf16 %v5451_v25  ;;  %v4677_v35 = vunpack.i.h.bf16 %v5451_v25 }
  0xf5   : > { %4739 = vrot.lane.b32.xlu1 %v4698_v40, %s4935_s29  ;;  %1615 = vrot.lane.b32.xlu0 %v5439_v19, %s4935_s29  ;;  %v5551_v40 = vpack.i.bf16 %v5428_v38, %v5411_v24 }
  0xf7   : > { %v4670_v29 = vpop.permute.xlu2 %4669 }
  0xf8   : > { %v4672_v17 = vunpack.i.h.bf16 %v4670_v29  ;;  %v4671_v21 = vunpack.i.l.bf16 %v4670_v29 }
  0xfa   : > { %v912_v30 = vsel %vm909_vm8, %v4671_v21, %v4672_v17  ;;  %v913_v58 = vsel %vm909_vm8, %v4672_v17, %v4676_v27 }
  0xfb   : > { %1000 = vmatpush.msra.mxu2 %v912_v30  ;;  %4744 = vrot.lane.b32.xlu2 %v4703_v18, %s4935_s29 }
  0xfc   : > { %1020 = vmatpush.msra.mxu3 %v913_v58  ;;  %4500 = vmatmul.msk.f32.vlgmr.msra.gmra.mxu2 %vm942_vm9, %v5485_v46 }
  0xfd   : > { %1994 = vrot.lane.b32.xlu1 %v5358_v41, %s4937_s5  ;;  %4754 = vrot.lane.b32.xlu0 %v4753_v31, %s4933_s25 }
  0xfe   : > { %4501 = vmatmul.msk.f32.vlgmr.msra.gmra.mxu3 %vm942_vm9, %v5485_v46 }
 0x103   : > { %4749 = vrot.lane.b32.xlu2 %v4748_v23, %s4933_s25 }
 0x105   : > { %2351 = vrot.lane.b32.xlu1 %v5358_v41, %s4938_s6  ;;  %4764 = vrot.lane.b32.xlu0 %v4763_v33, %s4933_s25 }
 0x107   : > { %v4680_v8 = vpop.permute.xlu2 %4679 }
 0x108   : > { %v4681_v37 = vunpack.i.l.bf16 %v4680_v8  ;;  %v4682_v48 = vunpack.i.h.bf16 %v4680_v8 }
 0x10a   : > { %v911_v39 = vsel %vm909_vm8, %v4681_v37, %v4671_v21  ;;  %v910_v42 = vsel %vm909_vm8, %v4677_v35, %v4681_v37 }
 0x10b   : > { %980 = vmatpush.msra.mxu1 %v911_v39  ;;  %4759 = vrot.lane.b32.xlu2 %v4758_v28, %s4933_s25 }
 0x10c   : > { %960 = vmatpush.msra.mxu0 %v910_v42  ;;  %4499 = vmatmul.msk.f32.vlgmr.msra.gmra.mxu1 %vm942_vm9, %v5485_v46 }
 0x10d   : > { %4769 = vrot.lane.b32.xlu1 %v4768_v43, %s4933_s25  ;;  %4779 = vrot.lane.b32.xlu0 %v4778_v45, %s4933_s25 }
 0x10e   : > { %4498 = vmatmul.msk.f32.vlgmr.msra.gmra.mxu0 %vm942_vm9, %v5485_v46 }
 0x113   : > { %4774 = vrot.lane.b32.xlu2 %v4773_v13, %s4933_s25 }
 0x115   : > { %4784 = vrot.lane.b32.xlu1 %v4783_v47, %s4933_s25  ;;  %4789 = vrot.lane.b32.xlu0 %v4748_v23, %s4935_s29 }
 0x11b   : > { %2396 = vrot.lane.b32.xlu2 %v5422_v36, %s4933_s25 }
 0x11d   : > { %4794 = vrot.lane.b32.xlu1 %v4753_v31, %s4935_s29  ;;  %4799 = vrot.lane.b32.xlu0 %v4758_v28, %s4935_s29 }
 0x123   : > { %2774 = vrot.lane.b32.xlu2 %v5358_v41, %s4939_s7 }
 0x125   : > { %4804 = vrot.lane.b32.xlu1 %v4763_v33, %s4935_s29  ;;  %4814 = vrot.lane.b32.xlu0 %v4773_v13, %s4935_s29 }
 0x127   : > { %v4695_v49 = vpop.permute.xlu2 %4694  ;;  %v4685_v50 = vpop.permute.xlu0 %4684 }
 0x128   : > { %v4697_v52 = vunpack.i.h.bf16 %v4695_v49  ;;  %v4696_v1 = vunpack.i.l.bf16 %v4695_v49  ;;  %v4687_v22 = vunpack.i.h.bf16 %v4685_v50  ;;  %v4686_v53 = vunpack.i.l.bf16 %v4685_v50 }
 0x12a   : > { %v916_v57 = vsel %vm909_vm8, %v4682_v48, %v4686_v53  ;;  %v917_v0 = vsel %vm909_vm8, %v4686_v53, %v4687_v22  ;;  %v921_v34 = vsel %vm909_vm8, %v4696_v1, %v4697_v52 }
 0x12b   : > { %4809 = vrot.lane.b32.xlu2 %v4768_v43, %s4935_s29  ;;  %1080 = vmatpush.msrb.mxu2 %v916_v57 }
 0x12c   : > { %1100 = vmatpush.msrb.mxu3 %v917_v0  ;;  %4504 = vmatmul.msk.f32.vlgmr.msrb.gmra.mxu2 %vm942_vm9, %v5485_v46 }
 0x12d   : > { %4819 = vrot.lane.b32.xlu1 %v4778_v45, %s4935_s29  ;;  %2802 = vrot.lane.b32.xlu0 %v5422_v36, %s4935_s29 }
 0x12e   : > { %1180 = vmatpush.msra.mxu3 %v921_v34 }
 0x12f   : > { %4505 = vmatmul.msk.f32.vlgmr.msrb.gmra.mxu3 %vm942_vm9, %v5485_v46  ;;  %v4690_v51 = vpop.permute.xlu1 %4689 }
 0x130   : > { %v4692_v61 = vunpack.i.h.bf16 %v4690_v51  ;;  %v4691_v4 = vunpack.i.l.bf16 %v4690_v51 }
 0x132   : > { %v915_v5 = vsel %vm909_vm8, %v4691_v4, %v4682_v48  ;;  %v914_v7 = vsel %vm909_vm8, %v4676_v27, %v4691_v4  ;;  %v920_v9 = vsel %vm909_vm8, %v4692_v61, %v4696_v1  ;;  %v4853_v27 = vpack.i.bf16 %v5422_v36, %v5439_v19 }
 0x133   : > { %1060 = vmatpush.msrb.mxu1 %v915_v5  ;;  %4824 = vrot.lane.b32.xlu2 %v4783_v47, %s4935_s29 }
 0x134   : > { %1040 = vmatpush.msrb.mxu0 %v914_v7  ;;  %1160 = vmatpush.msra.mxu2 %v920_v9 }
 0x135   : > { %3180 = vrot.lane.b32.xlu1 %v5358_v41, %s4940_s8  ;;  %4502 = vmatmul.msk.f32.vlgmr.msrb.gmra.mxu0 %vm942_vm9, %v5485_v46 }
 0x136   : > { %4834 = vrot.lane.b32.xlu0 %v4833_v10, %s4933_s25  ;;  %4503 = vmatmul.msk.f32.vlgmr.msrb.gmra.mxu1 %vm942_vm9, %v5485_v46 }
 0x137   : > { %4508 = vmatmul.msk.f32.vlgmr.msra.gmra.mxu2 %vm942_vm9, %v5485_v46  ;;  %4509 = vmatmul.msk.f32.vlgmr.msra.gmra.mxu3 %vm942_vm9, %v5485_v46 }
 0x13b   : > { %4829 = vrot.lane.b32.xlu2 %v4828_v2, %s4933_s25 }
 0x13d   : > { %3537 = vrot.lane.b32.xlu1 %v5358_v41, %s4941_s9  ;;  %v902_v25 = vpop.permute.xlu2 %901 }
 0x13e   : > { %4844 = vrot.lane.b32.xlu0 %v4843_v12, %s4933_s25  ;;  %v922_v30 = vsel %vm909_vm8, %v4697_v52, %v902_v25 }
 0x143   : > { %4839 = vrot.lane.b32.xlu2 %v4838_v15, %s4933_s25 }
 0x145   : > { %4849 = vrot.lane.b32.xlu1 %v4848_v20, %s4933_s25  ;;  %v5614_v28 = vpop.permute.xlu2 %1587 }
 0x146   : > { %4859 = vrot.lane.b32.xlu0 %v5551_v40, %s4933_s25 }
 0x147   : > { %v4700_v16 = vpop.permute.xlu0 %4699 }
 0x148   : > { %v4702_v55 = vunpack.i.h.bf16 %v4700_v16  ;;  %v4701_v18 = vunpack.i.l.bf16 %v4700_v16 }
 0x14a   : > { %v918_v29 = vsel %vm909_vm8, %v4687_v22, %v4701_v18  ;;  %v919_v17 = vsel %vm909_vm8, %v4701_v18, %v4692_v61  ;;  %v923_v21 = vsel %vm909_vm8, %v902_v25, %v4702_v55 }
 0x14b   : > { %4854 = vrot.lane.b32.xlu2 %v4853_v27, %s4933_s25  ;;  %1120 = vmatpush.msra.mxu0 %v918_v29 }
 0x14c   : > { %1140 = vmatpush.msra.mxu1 %v919_v17  ;;  %4506 = vmatmul.msk.f32.vlgmr.msra.gmra.mxu0 %vm942_vm9, %v5485_v46 }
 0x14d   : > { %4507 = vmatmul.msk.f32.vlgmr.msra.gmra.mxu1 %vm942_vm9, %v5485_v46  ;;  %1200 = vmatpush.msrb.mxu0 %v922_v30  ;;  %v4730_v52 = vpop.permute.xlu2 %4729 }
 0x14e   : > { %1220 = vmatpush.msrb.mxu1 %v923_v21  ;;  %4864 = vrot.lane.b32.xlu1 %v4932_v63, %s4933_s25  ;;  %v4731_v53 = vunpack.i.l.bf16 %v4730_v52 }
 0x14f   : > { %4869 = vrot.lane.b32.xlu0 %v4828_v2, %s4935_s29  ;;  %v4705_v58 = vpop.permute.xlu1 %4704  ;;  %1282 = vmatpush.msra.mxu0 %v4932_v63  ;;  %v4710_v8 = vpop.permute.xlu0 %4709  ;;  %v4732_v2 = vunpack.i.h.bf16 %v4730_v52 }
 0x150   : > { %1302 = vmatpush.msra.mxu1 %v5379_v54  ;;  %v4707_v31 = vunpack.i.h.bf16 %v4705_v58  ;;  %v4706_v23 = vunpack.i.l.bf16 %v4705_v58  ;;  %v4712_v45 = vunpack.i.h.bf16 %v4710_v8 }
 0x152   : > { %v924_v33 = vsel %vm909_vm8, %v4702_v55, %v4706_v23  ;;  %v925_v35 = vsel %vm909_vm8, %v4706_v23, %v4707_v31 }
 0x153   : > { %3582 = vrot.lane.b32.xlu2 %v5431_v6, %s4933_s25  ;;  %1240 = vmatpush.msrb.mxu2 %v924_v33 }
 0x154   : > { %1260 = vmatpush.msrb.mxu3 %v925_v35  ;;  %4510 = vmatmul.msk.f32.vlgmr.msrb.gmra.mxu0 %vm942_vm9, %v5485_v46 }
 0x155   : > { %4511 = vmatmul.msk.f32.vlgmr.msrb.gmra.mxu1 %vm942_vm9, %v5485_v46  ;;  %4512 = vmatmul.msk.f32.vlgmr.msrb.gmra.mxu2 %vm942_vm9, %v5485_v46 }
 0x156   : > { %4513 = vmatmul.msk.f32.vlgmr.msrb.gmra.mxu3 %vm942_vm9, %v5485_v46  ;;  %1322 = vmatpush.msra.mxu2 %v5365_v59  ;;  %v4711_v46 = vunpack.i.l.bf16 %v4710_v8 }
 0x157   : > { %1342 = vmatpush.msra.mxu3 %v5362_v44  ;;  %1362 = vmatpush.msrb.mxu0 %v5343_v32  ;;  %v4715_v37 = vpop.permute.xlu1 %4714  ;;  %v4720_v39 = vpop.permute.xlu0 %4719 }
 0x158   : > { %1382 = vmatpush.msrb.mxu1 %v5401_v14  ;;  %4874 = vrot.lane.b32.xlu1 %v4833_v10, %s4935_s29  ;;  %v4717_v42 = vunpack.i.h.bf16 %v4715_v37  ;;  %v4721_v43 = vunpack.i.l.bf16 %v4720_v39  ;;  %v4716_v13 = vunpack.i.l.bf16 %v4715_v37  ;;  %v4722_v1 = vunpack.i.h.bf16 %v4720_v39 }
 0x159   : > { %4879 = vrot.lane.b32.xlu0 %v4838_v15, %s4935_s29  ;;  %1402 = vmatpush.msrb.mxu2 %v5381_v56 }
 0x15a   : > { %1422 = vmatpush.msrb.mxu3 %v5389_v60  ;;  %v1624_v48 = vsel %vm1623_vm10, %v4717_v42, %v4721_v43  ;;  %v1625_v49 = vsel %vm1623_vm10, %v4721_v43, %v4711_v46  ;;  %v1627_v50 = vsel %vm1623_vm10, %v4712_v45, %v4716_v13  ;;  %v1628_v0 = vsel %vm1623_vm10, %v4716_v13, %v4731_v53 }
 0x15b   : > { %3960 = vrot.lane.b32.xlu2 %v5358_v41, %s4942_s10  ;;  %v1629_v51 = vsel %vm1623_vm10, %v4731_v53, %v4722_v1 }
 0x15c   : > { %4514 = vmatmul.msk.f32.vlgmr.msra.gmra.mxu0 %vm942_vm9, %v5358_v41 }
 0x15d   : > { %4515 = vmatmul.msk.f32.vlgmr.msra.gmra.mxu1 %vm942_vm9, %v5358_v41  ;;  %4516 = vmatmul.msk.f32.vlgmr.msra.gmra.mxu2 %vm942_vm9, %v5358_v41 }
 0x15e   : > { %4517 = vmatmul.msk.f32.vlgmr.msra.gmra.mxu3 %vm942_vm9, %v5358_v41  ;;  %1442 = vmatpush.msra.mxu0 %v5391_v62 }
 0x15f   : > { %1462 = vmatpush.msra.mxu1 %v5420_v26  ;;  %1482 = vmatpush.msra.mxu2 %v5398_v3  ;;  %v4725_v47 = vpop.permute.xlu1 %4724  ;;  %v4735_v4 = vpop.permute.xlu0 %4734 }
 0x160   : > { %1502 = vmatpush.msra.mxu3 %v5411_v24  ;;  %4884 = vrot.lane.b32.xlu1 %v4843_v12, %s4935_s29  ;;  %v4726_v22 = vunpack.i.l.bf16 %v4725_v47  ;;  %v4727_v57 = vunpack.i.h.bf16 %v4725_v47  ;;  %v4736_v9 = vunpack.i.l.bf16 %v4735_v4  ;;  %v4737_v10 = vunpack.i.h.bf16 %v4735_v4 }
 0x161   : > { %4894 = vrot.lane.b32.xlu0 %v4853_v27, %s4935_s29 }
 0x162   : > { %v1630_v61 = vsel %vm1623_vm10, %v4722_v1, %v4726_v22  ;;  %v1631_v5 = vsel %vm1623_vm10, %v4726_v22, %v4727_v57  ;;  %v1634_v15 = vsel %vm1623_vm10, %v4732_v2, %v4736_v9 }
 0x163   : > { %4889 = vrot.lane.b32.xlu2 %v4848_v20, %s4935_s29  ;;  %v1635_v20 = vsel %vm1623_vm10, %v4736_v9, %v4737_v10 }
 0x164   : > { %4518 = vmatmul.msk.f32.vlgmr.msrb.gmra.mxu0 %vm942_vm9, %v5358_v41 }
 0x165   : > { %4519 = vmatmul.msk.f32.vlgmr.msrb.gmra.mxu1 %vm942_vm9, %v5358_v41  ;;  %4520 = vmatmul.msk.f32.vlgmr.msrb.gmra.mxu2 %vm942_vm9, %v5358_v41 }
 0x166   : > { %4521 = vmatmul.msk.f32.vlgmr.msrb.gmra.mxu3 %vm942_vm9, %v5358_v41  ;;  %1522 = vmatpush.msrb.mxu0 %v5413_v11 }
 0x167   : > { %1542 = vmatpush.msrb.mxu1 %v5439_v19  ;;  %1562 = vmatpush.msrb.mxu2 %v5422_v36  ;;  %v4740_v34 = vpop.permute.xlu1 %4739  ;;  %v1616_v55 = vpop.permute.xlu0 %1615 }
 0x168   : > { %1582 = vmatpush.msrb.mxu3 %v5431_v6  ;;  %4899 = vrot.lane.b32.xlu1 %v5551_v40, %s4935_s29  ;;  %v4741_v7 = vunpack.i.l.bf16 %v4740_v34  ;;  %v4745_v40 = vpop.permute.xlu2 %4744  ;;  %v4742_v16 = vunpack.i.h.bf16 %v4740_v34  ;;  %v1636_v27 = vsel %vm1623_vm10, %v4737_v10, %v1616_v55 }
 0x169   : > { %3988 = vrot.lane.b32.xlu0 %v5431_v6, %s4935_s29  ;;  %v4747_v18 = vunpack.i.h.bf16 %v4745_v40  ;;  %v4746_v25 = vunpack.i.l.bf16 %v4745_v40 }
 0x16a   : > { %v1633_v12 = vsel %vm1623_vm10, %v4741_v7, %v4732_v2  ;;  %v1637_v29 = vsel %vm1623_vm10, %v1616_v55, %v4742_v16 }
 0x16b   : > { %4904 = vrot.lane.b32.xlu2 %v4932_v63, %s4935_s29  ;;  %v1626_v63 = vsel %vm1623_vm10, %v4711_v46, %v4712_v45  ;;  %v1638_v17 = vsel %vm1623_vm10, %v4742_v16, %v4746_v25  ;;  %v1639_v21 = vsel %vm1623_vm10, %v4746_v25, %v4747_v18 }
 0x16c   : > { %4522 = vmatmul.msk.f32.vlgmr.msra.gmra.mxu0 %vm942_vm9, %v5358_v41 }
 0x16d   : > { %4523 = vmatmul.msk.f32.vlgmr.msra.gmra.mxu1 %vm942_vm9, %v5358_v41  ;;  %4524 = vmatmul.msk.f32.vlgmr.msra.gmra.mxu2 %vm942_vm9, %v5358_v41 }
 0x16e   : > { %4525 = vmatmul.msk.f32.vlgmr.msra.gmra.mxu3 %vm942_vm9, %v5358_v41  ;;  %1673 = vmatpush.msra.mxu0 %v1624_v48 }
 0x16f   : > { %1693 = vmatpush.msra.mxu1 %v1625_v49  ;;  %1713 = vmatpush.msra.mxu2 %v1626_v63 }
 0x170   : > { %1733 = vmatpush.msra.mxu3 %v1627_v50 }
 0x174   : > { %4526 = vmatmul.msk.f32.vlgmr.msrb.gmra.mxu0 %vm942_vm9, %v5358_v41 }
 0x175   : > { %4527 = vmatmul.msk.f32.vlgmr.msrb.gmra.mxu1 %vm942_vm9, %v5358_v41  ;;  %4528 = vmatmul.msk.f32.vlgmr.msrb.gmra.mxu2 %vm942_vm9, %v5358_v41 }
 0x176   : > { %4529 = vmatmul.msk.f32.vlgmr.msrb.gmra.mxu3 %vm942_vm9, %v5358_v41  ;;  %1753 = vmatpush.msrb.mxu0 %v1628_v0  ;;  %v1632_v41 = vsel %vm1623_vm10, %v4727_v57, %v4741_v7 }
 0x177   : > { %1773 = vmatpush.msrb.mxu1 %v1629_v51  ;;  %1793 = vmatpush.msrb.mxu2 %v1630_v61 }
 0x178   : > { %1813 = vmatpush.msrb.mxu3 %v1631_v5 }
 0x17c   : > { %4530 = vmatmul.msk.f32.vlgmr.msra.gmra.mxu0 %vm942_vm9, %v5614_v28 }
 0x17d   : > { %4531 = vmatmul.msk.f32.vlgmr.msra.gmra.mxu1 %vm942_vm9, %v5614_v28  ;;  %4532 = vmatmul.msk.f32.vlgmr.msra.gmra.mxu2 %vm942_vm9, %v5614_v28 }
 0x17e   : > { %4533 = vmatmul.msk.f32.vlgmr.msra.gmra.mxu3 %vm942_vm9, %v5614_v28  ;;  %1833 = vmatpush.msra.mxu0 %v1632_v41 }
 0x17f   : > { %1853 = vmatpush.msra.mxu1 %v1633_v12  ;;  %1873 = vmatpush.msra.mxu2 %v1634_v15  ;;  %v5738_v22 = vpop.f32.mrf.mxu2 }
 0x180   : > { %1893 = vmatpush.msra.mxu3 %v1635_v20 }
 0x181   : > { %v5742_v53 = vpop.f32.mrf.mxu3 }
 0x184   : > { %4534 = vmatmul.msk.f32.vlgmr.msrb.gmra.mxu0 %vm942_vm9, %v5614_v28 }
 0x185   : > { %4535 = vmatmul.msk.f32.vlgmr.msrb.gmra.mxu1 %vm942_vm9, %v5614_v28  ;;  %4536 = vmatmul.msk.f32.vlgmr.msrb.gmra.mxu2 %vm942_vm9, %v5614_v28 }
 0x186   : > { %4537 = vmatmul.msk.f32.vlgmr.msrb.gmra.mxu3 %vm942_vm9, %v5614_v28  ;;  %1913 = vmatpush.msrb.mxu0 %v1636_v27 }
 0x187   : > { %1933 = vmatpush.msrb.mxu1 %v1637_v29  ;;  %1953 = vmatpush.msrb.mxu2 %v1638_v17 }
 0x188   : > { %1973 = vmatpush.msrb.mxu3 %v1639_v21 }
 0x189   : > { %v5736_v47 = vpop.f32.mrf.mxu1 }
 0x18b   : > { %v5733_v45 = vpop.f32.mrf.mxu0 }
 0x18c   : > { %4538 = vmatmul.msk.f32.vlgmr.msra.gmra.mxu0 %vm942_vm9, %v5614_v28 }
 0x18d   : > { %4539 = vmatmul.msk.f32.vlgmr.msra.gmra.mxu1 %vm942_vm9, %v5614_v28  ;;  %4540 = vmatmul.msk.f32.vlgmr.msra.gmra.mxu2 %vm942_vm9, %v5614_v28 }
 0x18e   : > { %4541 = vmatmul.msk.f32.vlgmr.msra.gmra.mxu3 %vm942_vm9, %v5614_v28  ;;  %2013 = vmatpush.msra.mxu0 %v5379_v54 }
 0x18f   : > { %2033 = vmatpush.msra.mxu1 %v5365_v59  ;;  %2053 = vmatpush.msra.mxu2 %v5362_v44  ;;  %v4750_v44 = vpop.permute.xlu2 %4749  ;;  %v4755_v59 = vpop.permute.xlu0 %4754 }
 0x190   : > { %2073 = vmatpush.msra.mxu3 %v5343_v32  ;;  %v1995_v32 = vpop.permute.xlu1 %1994  ;;  %v4756_v30 = vunpack.i.l.bf16 %v4755_v59 }
 0x194   : > { %4542 = vmatmul.msk.f32.vlgmr.msrb.gmra.mxu0 %vm942_vm9, %v5614_v28 }
 0x195   : > { %4543 = vmatmul.msk.f32.vlgmr.msrb.gmra.mxu1 %vm942_vm9, %v5614_v28  ;;  %4544 = vmatmul.msk.f32.vlgmr.msrb.gmra.mxu2 %vm942_vm9, %v5614_v28 }
 0x196   : > { %4545 = vmatmul.msk.f32.vlgmr.msrb.gmra.mxu3 %vm942_vm9, %v5614_v28  ;;  %2093 = vmatpush.msrb.mxu0 %v5401_v14 }
 0x197   : > { %2113 = vmatpush.msrb.mxu1 %v5381_v56  ;;  %2133 = vmatpush.msrb.mxu2 %v5389_v60  ;;  %v4760_v56 = vpop.permute.xlu2 %4759  ;;  %v4765_v60 = vpop.permute.xlu0 %4764 }
 0x198   : > { %2153 = vmatpush.msrb.mxu3 %v5391_v62  ;;  %v5708_v54 = vpop.permute.xlu1 %2351  ;;  %v4757_v62 = vunpack.i.h.bf16 %v4755_v59  ;;  %v4766_v35 = vunpack.i.l.bf16 %v4765_v60  ;;  %v4767_v37 = vunpack.i.h.bf16 %v4765_v60  ;;  %v4762_v28 = vunpack.i.h.bf16 %v4760_v56 }
 0x19a   : > { %v2410_v43 = vsel %vm909_vm8, %v4762_v28, %v4766_v35  ;;  %v2411_v46 = vsel %vm909_vm8, %v4766_v35, %v4767_v37 }
 0x19c   : > { %4546 = vmatmul.msk.f32.vlgmr.msra.gmra.mxu0 %vm942_vm9, %v1995_v32 }
 0x19d   : > { %4547 = vmatmul.msk.f32.vlgmr.msra.gmra.mxu1 %vm942_vm9, %v1995_v32  ;;  %4548 = vmatmul.msk.f32.vlgmr.msra.gmra.mxu2 %vm942_vm9, %v1995_v32 }
 0x19e   : > { %4549 = vmatmul.msk.f32.vlgmr.msra.gmra.mxu3 %vm942_vm9, %v1995_v32  ;;  %2173 = vmatpush.msra.mxu0 %v5420_v26 }
 0x19f   : > { %2193 = vmatpush.msra.mxu1 %v5398_v3  ;;  %2213 = vmatpush.msra.mxu2 %v5411_v24  ;;  %v4752_v3 = vunpack.i.h.bf16 %v4750_v44  ;;  %v4751_v24 = vunpack.i.l.bf16 %v4750_v44  ;;  %v4775_v23 = vpop.permute.xlu2 %4774  ;;  %v4780_v8 = vpop.permute.xlu0 %4779 }
 0x1a0   : > { %2233 = vmatpush.msra.mxu3 %v5413_v11  ;;  %v4761_v11 = vunpack.i.l.bf16 %v4760_v56  ;;  %v4770_v31 = vpop.permute.xlu1 %4769  ;;  %v4781_v48 = vunpack.i.l.bf16 %v4780_v8  ;;  %v4777_v63 = vunpack.i.h.bf16 %v4775_v23  ;;  %v4776_v50 = vunpack.i.l.bf16 %v4775_v23 }
 0x1a1   : > { %v4771_v33 = vunpack.i.l.bf16 %v4770_v31  ;;  %v4772_v49 = vunpack.i.h.bf16 %v4770_v31  ;;  %v4782_v4 = vunpack.i.h.bf16 %v4780_v8 }
 0x1a2   : > { %v2404_v58 = vsel %vm909_vm8, %v4757_v62, %v4761_v11  ;;  %v2412_v57 = vsel %vm909_vm8, %v4767_v37, %v4781_v48  ;;  %v2415_v51 = vsel %vm909_vm8, %v4776_v50, %v4777_v63 }
 0x1a3   : > { %v2408_v39 = vsel %vm909_vm8, %v4756_v30, %v4771_v33  ;;  %v2409_v42 = vsel %vm909_vm8, %v4771_v33, %v4762_v28  ;;  %v2413_v0 = vsel %vm909_vm8, %v4781_v48, %v4772_v49  ;;  %v2414_v34 = vsel %vm909_vm8, %v4772_v49, %v4776_v50 }
 0x1a4   : > { %4550 = vmatmul.msk.f32.vlgmr.msrb.gmra.mxu0 %vm942_vm9, %v1995_v32 }
 0x1a5   : > { %4551 = vmatmul.msk.f32.vlgmr.msrb.gmra.mxu1 %vm942_vm9, %v1995_v32  ;;  %4552 = vmatmul.msk.f32.vlgmr.msrb.gmra.mxu2 %vm942_vm9, %v1995_v32 }
 0x1a6   : > { %4553 = vmatmul.msk.f32.vlgmr.msrb.gmra.mxu3 %vm942_vm9, %v1995_v32  ;;  %2253 = vmatpush.msrb.mxu0 %v5439_v19 }
 0x1a7   : > { %2273 = vmatpush.msrb.mxu1 %v5422_v36  ;;  %2293 = vmatpush.msrb.mxu2 %v5431_v6  ;;  %v2405_v36 = vsel %vm909_vm8, %v4761_v11, %v4751_v24  ;;  %v2407_v6 = vsel %vm909_vm8, %v4752_v3, %v4756_v30  ;;  %v2397_v52 = vpop.permute.xlu2 %2396  ;;  %v4790_v1 = vpop.permute.xlu0 %4789 }
 0x1a8   : > { %2313 = vmatpush.msrb.mxu3 %v5428_v38  ;;  %v2406_v38 = vsel %vm909_vm8, %v4751_v24, %v4752_v3  ;;  %v4785_v13 = vpop.permute.xlu1 %4784  ;;  %v2416_v2 = vsel %vm909_vm8, %v4777_v63, %v2397_v52  ;;  %v2417_v20 = vsel %vm909_vm8, %v2397_v52, %v4782_v4  ;;  %v4792_v29 = vunpack.i.h.bf16 %v4790_v1 }
 0x1a9   : > { %v4786_v5 = vunpack.i.l.bf16 %v4785_v13  ;;  %v4787_v10 = vunpack.i.h.bf16 %v4785_v13  ;;  %v4791_v17 = vunpack.i.l.bf16 %v4790_v1 }
 0x1ab   : > { %v2418_v40 = vsel %vm909_vm8, %v4782_v4, %v4786_v5  ;;  %v2419_v55 = vsel %vm909_vm8, %v4786_v5, %v4787_v10  ;;  %v2812_v60 = vsel %vm1623_vm10, %v4791_v17, %v4792_v29 }
 0x1ac   : > { %4554 = vmatmul.msk.f32.vlgmr.msra.gmra.mxu0 %vm942_vm9, %v1995_v32 }
 0x1ad   : > { %4555 = vmatmul.msk.f32.vlgmr.msra.gmra.mxu1 %vm942_vm9, %v1995_v32  ;;  %4556 = vmatmul.msk.f32.vlgmr.msra.gmra.mxu2 %vm942_vm9, %v1995_v32 }
 0x1ae   : > { %4557 = vmatmul.msk.f32.vlgmr.msra.gmra.mxu3 %vm942_vm9, %v1995_v32  ;;  %2453 = vmatpush.msra.mxu0 %v2404_v58 }
 0x1af   : > { %2473 = vmatpush.msra.mxu1 %v2405_v36  ;;  %2493 = vmatpush.msra.mxu2 %v2406_v38  ;;  %v5761_v41 = vpop.permute.xlu2 %2774  ;;  %v4800_v12 = vpop.permute.xlu0 %4799 }
 0x1b0   : > { %2513 = vmatpush.msra.mxu3 %v2407_v6  ;;  %v4795_v7 = vpop.permute.xlu1 %4794  ;;  %v5767_v15 = vpop.f32.mrf.mxu2  ;;  %v4801_v25 = vunpack.i.l.bf16 %v4800_v12  ;;  %v4802_v58 = vunpack.i.h.bf16 %v4800_v12 }
 0x1b1   : > { %v4797_v18 = vunpack.i.h.bf16 %v4795_v7 }
 0x1b2   : > { %v5754_v61 = vpop.f32.mrf.mxu0  ;;  %v5773_v16 = vpop.f32.mrf.mxu3  ;;  %v2811_v56 = vsel %vm1623_vm10, %v4801_v25, %v4791_v17 }
 0x1b3   : > { %v5756_v9 = vpop.f32.mrf.mxu1  ;;  %v2810_v59 = vsel %vm1623_vm10, %v4797_v18, %v4801_v25 }
 0x1b4   : > { %4558 = vmatmul.msk.f32.vlgmr.msrb.gmra.mxu0 %vm942_vm9, %v1995_v32 }
 0x1b5   : > { %4559 = vmatmul.msk.f32.vlgmr.msrb.gmra.mxu1 %vm942_vm9, %v1995_v32  ;;  %4560 = vmatmul.msk.f32.vlgmr.msrb.gmra.mxu2 %vm942_vm9, %v1995_v32 }
 0x1b6   : > { %4561 = vmatmul.msk.f32.vlgmr.msrb.gmra.mxu3 %vm942_vm9, %v1995_v32  ;;  %2533 = vmatpush.msrb.mxu0 %v2408_v39  ;;  %v4796_v32 = vunpack.i.l.bf16 %v4795_v7 }
 0x1b7   : > { %2553 = vmatpush.msrb.mxu1 %v2409_v42  ;;  %2573 = vmatpush.msrb.mxu2 %v2410_v43  ;;  %v4810_v3 = vpop.permute.xlu2 %4809  ;;  %v4815_v37 = vpop.permute.xlu0 %4814 }
 0x1b8   : > { %2593 = vmatpush.msrb.mxu3 %v2411_v46  ;;  %v4805_v44 = vpop.permute.xlu1 %4804  ;;  %v2813_v62 = vsel %vm1623_vm10, %v4792_v29, %v4796_v32  ;;  %v4811_v38 = vunpack.i.l.bf16 %v4810_v3  ;;  %v4816_v13 = vunpack.i.l.bf16 %v4815_v37  ;;  %v4817_v48 = vunpack.i.h.bf16 %v4815_v37 }
 0x1b9   : > { %v4806_v31 = vunpack.i.l.bf16 %v4805_v44  ;;  %v4807_v6 = vunpack.i.h.bf16 %v4805_v44  ;;  %v4812_v49 = vunpack.i.h.bf16 %v4810_v3  ;;  %v4911_v44 = vld [vmem:[#allocation2 + $0x18] sm:$0xff] }
 0x1ba   : > { %v5792_v24 = vpop.f32.mrf.mxu2  ;;  %v5794_v11 = vpop.f32.mrf.mxu3  ;;  %v2814_v23 = vsel %vm1623_vm10, %v4796_v32, %v4811_v38  ;;  %v2815_v35 = vsel %vm1623_vm10, %v4811_v38, %v4802_v58  ;;  %v2821_v1 = vsel %vm1623_vm10, %v4816_v13, %v4817_v48  ;;  %v4910_v32 = vld [vmem:[#allocation2 + $0x10] sm:$0xff] }
 0x1bb   : > { %v2816_v8 = vsel %vm1623_vm10, %v4802_v58, %v4806_v31  ;;  %v2817_v28 = vsel %vm1623_vm10, %v4806_v31, %v4807_v6  ;;  %v2820_v52 = vsel %vm1623_vm10, %v4812_v49, %v4816_v13 }
 0x1bc   : > { %4562 = vmatmul.msk.f32.vlgmr.msra.gmra.mxu0 %vm942_vm9, %v5708_v54 }
 0x1bd   : > { %4563 = vmatmul.msk.f32.vlgmr.msra.gmra.mxu1 %vm942_vm9, %v5708_v54  ;;  %4564 = vmatmul.msk.f32.vlgmr.msra.gmra.mxu2 %vm942_vm9, %v5708_v54 }
 0x1be   : > { %4565 = vmatmul.msk.f32.vlgmr.msra.gmra.mxu3 %vm942_vm9, %v5708_v54  ;;  %2613 = vmatpush.msra.mxu0 %v2412_v57 }
 0x1bf   : > { %2633 = vmatpush.msra.mxu1 %v2413_v0  ;;  %2653 = vmatpush.msra.mxu2 %v2414_v34  ;;  %v4825_v57 = vpop.permute.xlu2 %4824  ;;  %v2803_v5 = vpop.permute.xlu0 %2802 }
 0x1c0   : > { %2673 = vmatpush.msra.mxu3 %v2415_v51  ;;  %v4820_v33 = vpop.permute.xlu1 %4819  ;;  %v4827_v10 = vunpack.i.h.bf16 %v4825_v57  ;;  %v2822_v12 = vsel %vm1623_vm10, %v4817_v48, %v2803_v5 }
 0x1c1   : > { %v4821_v42 = vunpack.i.l.bf16 %v4820_v33  ;;  %v4822_v4 = vunpack.i.h.bf16 %v4820_v33 }
 0x1c3   : > { %v2818_v63 = vsel %vm1623_vm10, %v4807_v6, %v4821_v42  ;;  %v2819_v50 = vsel %vm1623_vm10, %v4821_v42, %v4812_v49  ;;  %v4917_v42 = vld [vmem:[#allocation2 + $0x58] sm:$0xff] }
 0x1c4   : > { %4566 = vmatmul.msk.f32.vlgmr.msrb.gmra.mxu0 %vm942_vm9, %v5708_v54 }
 0x1c5   : > { %4567 = vmatmul.msk.f32.vlgmr.msrb.gmra.mxu1 %vm942_vm9, %v5708_v54  ;;  %4568 = vmatmul.msk.f32.vlgmr.msrb.gmra.mxu2 %vm942_vm9, %v5708_v54 }
 0x1c6   : > { %4569 = vmatmul.msk.f32.vlgmr.msrb.gmra.mxu3 %vm942_vm9, %v5708_v54  ;;  %2693 = vmatpush.msrb.mxu0 %v2416_v2  ;;  %v4826_v2 = vunpack.i.l.bf16 %v4825_v57 }
 0x1c7   : > { %2713 = vmatpush.msrb.mxu1 %v2417_v20  ;;  %2733 = vmatpush.msrb.mxu2 %v2418_v40  ;;  %v2823_v20 = vsel %vm1623_vm10, %v2803_v5, %v4822_v4  ;;  %v4830_v37 = vpop.permute.xlu2 %4829 }
 0x1c8   : > { %2753 = vmatpush.msrb.mxu3 %v2419_v55  ;;  %v2824_v40 = vsel %vm1623_vm10, %v4822_v4, %v4826_v2  ;;  %v2825_v55 = vsel %vm1623_vm10, %v4826_v2, %v4827_v10  ;;  %v4922_v2 = vld [vmem:[#allocation2] sm:$0xff] }
 0x1c9   : > { %v5776_v27 = vpop.f32.mrf.mxu0 }
 0x1ca   : > { %v5778_v21 = vpop.f32.mrf.mxu1 }
 0x1cc   : > { %4570 = vmatmul.msk.f32.vlgmr.msra.gmra.mxu0 %vm942_vm9, %v5708_v54 }
 0x1cd   : > { %4571 = vmatmul.msk.f32.vlgmr.msra.gmra.mxu1 %vm942_vm9, %v5708_v54  ;;  %4572 = vmatmul.msk.f32.vlgmr.msra.gmra.mxu2 %vm942_vm9, %v5708_v54 }
 0x1ce   : > { %4573 = vmatmul.msk.f32.vlgmr.msra.gmra.mxu3 %vm942_vm9, %v5708_v54  ;;  %2859 = vmatpush.msra.mxu0 %v2810_v59  ;;  %v4912_v59 = vld [vmem:[#allocation2 + $0x20] sm:$0xff] }
 0x1cf   : > { %2879 = vmatpush.msra.mxu1 %v2811_v56  ;;  %2899 = vmatpush.msra.mxu2 %v2812_v60 }
 0x1d0   : > { %2919 = vmatpush.msra.mxu3 %v2813_v62 }
 0x1d1   : > { %v5796_v30 = vpop.f32.mrf.mxu0 }
 0x1d2   : > { %v5798_v36 = vpop.f32.mrf.mxu1 }
 0x1d4   : > { %4574 = vmatmul.msk.f32.vlgmr.msrb.gmra.mxu0 %vm942_vm9, %v5708_v54 }
 0x1d5   : > { %4575 = vmatmul.msk.f32.vlgmr.msrb.gmra.mxu1 %vm942_vm9, %v5708_v54  ;;  %4576 = vmatmul.msk.f32.vlgmr.msrb.gmra.mxu2 %vm942_vm9, %v5708_v54 }
 0x1d6   : > { %4577 = vmatmul.msk.f32.vlgmr.msrb.gmra.mxu3 %vm942_vm9, %v5708_v54  ;;  %2939 = vmatpush.msrb.mxu0 %v2814_v23 }
 0x1d7   : > { %2959 = vmatpush.msrb.mxu1 %v2815_v35  ;;  %2979 = vmatpush.msrb.mxu2 %v2816_v8  ;;  %v5893_v35 = vpop.permute.xlu1 %3180 }
 0x1d8   : > { %2999 = vmatpush.msrb.mxu3 %v2817_v28  ;;  %v5812_v39 = vpop.f32.mrf.mxu2  ;;  %v4916_v28 = vld [vmem:[#allocation2 + $0x50] sm:$0xff] }
 0x1d9   : > { %v5814_v43 = vpop.f32.mrf.mxu3  ;;  %v5816_v46 = vpop.f32.mrf.mxu0 }
 0x1da   : > { %v5818_v54 = vpop.f32.mrf.mxu1 }
 0x1dc   : > { %4578 = vmatmul.msk.f32.vlgmr.msra.gmra.mxu0 %vm942_vm9, %v5761_v41 }
 0x1dd   : > { %4579 = vmatmul.msk.f32.vlgmr.msra.gmra.mxu1 %vm942_vm9, %v5761_v41  ;;  %4580 = vmatmul.msk.f32.vlgmr.msra.gmra.mxu2 %vm942_vm9, %v5761_v41 }
 0x1de   : > { %4581 = vmatmul.msk.f32.vlgmr.msra.gmra.mxu3 %vm942_vm9, %v5761_v41  ;;  %3019 = vmatpush.msra.mxu0 %v2818_v63 }
 0x1df   : > { %3039 = vmatpush.msra.mxu1 %v2819_v50  ;;  %3059 = vmatpush.msra.mxu2 %v2820_v52 }
 0x1e0   : > { %3079 = vmatpush.msra.mxu3 %v2821_v1  ;;  %v5832_v0 = vpop.f32.mrf.mxu2 }
 0x1e1   : > { %v5834_v34 = vpop.f32.mrf.mxu3  ;;  %v5836_v51 = vpop.f32.mrf.mxu0 }
 0x1e2   : > { %v5838_v7 = vpop.f32.mrf.mxu1  ;;  %v1345_v13 = vadd.f32 %v5834_v34, %v5742_v53  ;;  %v4919_v53 = vld [vmem:[#allocation2 + $0x70] sm:$0xff]  ;;  %v4921_v34 = vld [vmem:[#allocation2 + $0x80] sm:$0xff] }
 0x1e4   : > { %4582 = vmatmul.msk.f32.vlgmr.msrb.gmra.mxu0 %vm942_vm9, %v5761_v41 }
 0x1e5   : > { %4583 = vmatmul.msk.f32.vlgmr.msrb.gmra.mxu1 %vm942_vm9, %v5761_v41  ;;  %4584 = vmatmul.msk.f32.vlgmr.msrb.gmra.mxu2 %vm942_vm9, %v5761_v41 }
 0x1e6   : > { %4585 = vmatmul.msk.f32.vlgmr.msrb.gmra.mxu3 %vm942_vm9, %v5761_v41  ;;  %3099 = vmatpush.msrb.mxu0 %v2822_v12 }
 0x1e7   : > { %3119 = vmatpush.msrb.mxu1 %v2823_v20  ;;  %3139 = vmatpush.msrb.mxu2 %v2824_v40 }
 0x1e8   : > { %3159 = vmatpush.msrb.mxu3 %v2825_v55  ;;  %v5852_v18 = vpop.f32.mrf.mxu2 }
 0x1e9   : > { %v5854_v25 = vpop.f32.mrf.mxu3  ;;  %v5856_v29 = vpop.f32.mrf.mxu0  ;;  %v1405_v57 = vadd.f32 %v5852_v18, %v5767_v15  ;;  %v4832_v15 = vunpack.i.h.bf16 %v4830_v37  ;;  %v4831_v18 = vunpack.i.l.bf16 %v4830_v37 }
 0x1ea   : > { %v5858_v17 = vpop.f32.mrf.mxu1  ;;  %v1425_v5 = vadd.f32 %v5854_v25, %v5773_v16 }
 0x1ec   : > { %4586 = vmatmul.msk.f32.vlgmr.msra.gmra.mxu0 %vm942_vm9, %v5761_v41 }
 0x1ed   : > { %4587 = vmatmul.msk.f32.vlgmr.msra.gmra.mxu1 %vm942_vm9, %v5761_v41  ;;  %4588 = vmatmul.msk.f32.vlgmr.msra.gmra.mxu2 %vm942_vm9, %v5761_v41 }
 0x1ee   : > { %4589 = vmatmul.msk.f32.vlgmr.msra.gmra.mxu3 %vm942_vm9, %v5761_v41  ;;  %3199 = vmatpush.msra.mxu0 %v4910_v32 }
 0x1ef   : > { %3219 = vmatpush.msra.mxu1 %v4911_v44  ;;  %3239 = vmatpush.msra.mxu2 %v4912_v59 }
 0x1f0   : > { %3259 = vmatpush.msra.mxu3 %v5401_v14  ;;  %v1484_v56 = vpop.f32.mrf.mxu2  ;;  %v4913_v14 = vld [vmem:[#allocation2 + $0x30] sm:$0xff] }
 0x1f1   : > { %v5870_v60 = vadd.f32 %v1484_v56, %v5792_v24  ;;  %v1504_v62 = vpop.f32.mrf.mxu3  ;;  %v5872_v3 = vpop.f32.mrf.mxu0  ;;  %v4914_v24 = vld [vmem:[#allocation2 + $0x38] sm:$0xff] }
 0x1f2   : > { %v5875_v58 = vadd.f32 %v1504_v62, %v5794_v11  ;;  %v5877_v31 = vpop.f32.mrf.mxu1  ;;  %v4915_v11 = vld [vmem:[#allocation2 + $0x40] sm:$0xff] }
 0x1f4   : > { %4590 = vmatmul.msk.f32.vlgmr.msrb.gmra.mxu0 %vm942_vm9, %v5761_v41 }
 0x1f5   : > { %4591 = vmatmul.msk.f32.vlgmr.msrb.gmra.mxu1 %vm942_vm9, %v5761_v41  ;;  %4592 = vmatmul.msk.f32.vlgmr.msrb.gmra.mxu2 %vm942_vm9, %v5761_v41 }
 0x1f6   : > { %4593 = vmatmul.msk.f32.vlgmr.msrb.gmra.mxu3 %vm942_vm9, %v5761_v41  ;;  %3279 = vmatpush.msrb.mxu0 %v4913_v14  ;;  %v3592_v14 = vsel %vm909_vm8, %v4831_v18, %v4832_v15 }
 0x1f7   : > { %3299 = vmatpush.msrb.mxu1 %v4914_v24  ;;  %3319 = vmatpush.msrb.mxu2 %v4915_v11 }
 0x1f8   : > { %3339 = vmatpush.msrb.mxu3 %v5420_v26  ;;  %v1564_v38 = vpop.f32.mrf.mxu2  ;;  %v5906_v26 = vpop.permute.xlu0 %4834 }
 0x1f9   : > { %v5889_v6 = vadd.f32 %v1564_v38, %v5812_v39  ;;  %v1584_v23 = vpop.f32.mrf.mxu3  ;;  %v5891_v33 = vpop.f32.mrf.mxu0  ;;  %v1325_v39 = vadd.f32 %v5832_v0, %v5738_v22  ;;  %v4920_v0 = vld [vmem:[#allocation2 + $0x78] sm:$0xff]  ;;  %v4837_v12 = vunpack.i.h.bf16 %v5906_v26  ;;  %v4836_v56 = vunpack.i.l.bf16 %v5906_v26 }
 0x1fa   : > { %v5896_v8 = vadd.f32 %v1584_v23, %v5814_v43  ;;  %v5898_v41 = vpop.f32.mrf.mxu1  ;;  %v4918_v43 = vld [vmem:[#allocation2 + $0x60] sm:$0xff]  ;;  %v5923_v22 = vpop.permute.xlu1 %3537 }
 0x1fb   : > { %v3593_v24 = vsel %vm909_vm8, %v4832_v15, %v4836_v56 }
 0x1fc   : > { %4594 = vmatmul.msk.f32.vlgmr.msra.gmra.mxu0 %vm942_vm9, %v5893_v35 }
 0x1fd   : > { %4595 = vmatmul.msk.f32.vlgmr.msra.gmra.mxu1 %vm942_vm9, %v5893_v35  ;;  %4596 = vmatmul.msk.f32.vlgmr.msra.gmra.mxu2 %vm942_vm9, %v5893_v35 }
 0x1fe   : > { %4597 = vmatmul.msk.f32.vlgmr.msra.gmra.mxu3 %vm942_vm9, %v5893_v35  ;;  %3359 = vmatpush.msra.mxu0 %v4916_v28 }
 0x1ff   : > { %3379 = vmatpush.msra.mxu1 %v4917_v42  ;;  %3399 = vmatpush.msra.mxu2 %v4918_v43 }
 0x200   : > { %3419 = vmatpush.msra.mxu3 %v5439_v19  ;;  %v1715_v48 = vpop.f32.mrf.mxu2  ;;  %v4840_v19 = vpop.permute.xlu2 %4839 }
 0x201   : > { %v5915_v49 = vadd.f32 %v1715_v48, %v1325_v39  ;;  %v1735_v63 = vpop.f32.mrf.mxu3  ;;  %v5917_v50 = vpop.f32.mrf.mxu0  ;;  %v4841_v32 = vunpack.i.l.bf16 %v4840_v19 }
 0x202   : > { %v5919_v52 = vadd.f32 %v1735_v63, %v1345_v13  ;;  %v5921_v1 = vpop.f32.mrf.mxu1  ;;  %v5935_v4 = vpop.permute.xlu0 %4844  ;;  %v4842_v63 = vunpack.i.h.bf16 %v4840_v19 }
 0x203   : > { %v3590_v16 = vsel %vm909_vm8, %v4837_v12, %v4841_v32  ;;  %v4850_v25 = vpop.permute.xlu1 %4849  ;;  %v3591_v62 = vsel %vm909_vm8, %v4841_v32, %v4831_v18  ;;  %v4846_v39 = vunpack.i.l.bf16 %v5935_v4  ;;  %v4847_v48 = vunpack.i.h.bf16 %v5935_v4 }
 0x204   : > { %4598 = vmatmul.msk.f32.vlgmr.msrb.gmra.mxu0 %vm942_vm9, %v5893_v35  ;;  %v4851_v23 = vunpack.i.l.bf16 %v4850_v25 }
 0x205   : > { %4599 = vmatmul.msk.f32.vlgmr.msrb.gmra.mxu1 %vm942_vm9, %v5893_v35  ;;  %4600 = vmatmul.msk.f32.vlgmr.msrb.gmra.mxu2 %vm942_vm9, %v5893_v35  ;;  %v3597_v19 = vsel %vm909_vm8, %v4846_v39, %v4847_v48 }
 0x206   : > { %4601 = vmatmul.msk.f32.vlgmr.msrb.gmra.mxu3 %vm942_vm9, %v5893_v35  ;;  %3439 = vmatpush.msrb.mxu0 %v4919_v53  ;;  %v3596_v53 = vsel %vm909_vm8, %v4842_v63, %v4846_v39 }
 0x207   : > { %3459 = vmatpush.msrb.mxu1 %v4920_v0  ;;  %3479 = vmatpush.msrb.mxu2 %v4921_v34 }
 0x208   : > { %v1795_v10 = vpop.f32.mrf.mxu2  ;;  %3499 = vmatpush.msrb.mxu3 %v4922_v2  ;;  %v5961_v11 = vpop.permute.xlu2 %4854 }
 0x209   : > { %v5940_v20 = vadd.f32 %v1795_v10, %v1405_v57  ;;  %v1815_v40 = vpop.f32.mrf.mxu3  ;;  %v5942_v55 = vpop.f32.mrf.mxu0  ;;  %v4856_v15 = vunpack.i.l.bf16 %v5961_v11 }
 0x20a   : > { %v5944_v44 = vadd.f32 %v1815_v40, %v1425_v5  ;;  %v5946_v59 = vpop.f32.mrf.mxu1  ;;  %v5969_v42 = vpop.permute.xlu0 %4859  ;;  %v4857_v40 = vunpack.i.h.bf16 %v5961_v11 }
 0x20b   : > { %v4865_v57 = vpop.permute.xlu1 %4864  ;;  %v4861_v34 = vunpack.i.l.bf16 %v5969_v42 }
 0x20c   : > { %4602 = vmatmul.msk.f32.vlgmr.msra.gmra.mxu0 %vm942_vm9, %v5893_v35  ;;  %v4866_v39 = vunpack.i.l.bf16 %v4865_v57 }
 0x20d   : > { %4603 = vmatmul.msk.f32.vlgmr.msra.gmra.mxu1 %vm942_vm9, %v5893_v35  ;;  %4604 = vmatmul.msk.f32.vlgmr.msra.gmra.mxu2 %vm942_vm9, %v5893_v35 }
 0x20e   : > { %4605 = vmatmul.msk.f32.vlgmr.msra.gmra.mxu3 %vm942_vm9, %v5893_v35  ;;  %3639 = vmatpush.msra.mxu0 %v3590_v16 }
 0x20f   : > { %3659 = vmatpush.msra.mxu1 %v3591_v62  ;;  %3679 = vmatpush.msra.mxu2 %v3592_v14  ;;  %v3601_v62 = vsel %vm909_vm8, %v4856_v15, %v4857_v40 }
 0x210   : > { %3699 = vmatpush.msra.mxu3 %v3593_v24  ;;  %v1875_v38 = vpop.f32.mrf.mxu2  ;;  %v3583_v18 = vpop.permute.xlu2 %3582 }
 0x211   : > { %v5964_v37 = vadd.f32 %v1875_v38, %v5870_v60  ;;  %v1895_v26 = vpop.f32.mrf.mxu3  ;;  %v5966_v28 = vpop.f32.mrf.mxu0  ;;  %v3594_v60 = vsel %vm909_vm8, %v4836_v56, %v4851_v23 }
 0x212   : > { %v5972_v43 = vadd.f32 %v1895_v26, %v5875_v58  ;;  %v5974_v13 = vpop.f32.mrf.mxu1  ;;  %v3595_v58 = vsel %vm909_vm8, %v4851_v23, %v4842_v63  ;;  %v6002_v32 = vpop.permute.xlu0 %4869  ;;  %v4862_v26 = vunpack.i.h.bf16 %v5969_v42 }
 0x214   : > { %4606 = vmatmul.msk.f32.vlgmr.msrb.gmra.mxu0 %vm942_vm9, %v5893_v35 }
 0x215   : > { %4607 = vmatmul.msk.f32.vlgmr.msrb.gmra.mxu1 %vm942_vm9, %v5893_v35  ;;  %4608 = vmatmul.msk.f32.vlgmr.msrb.gmra.mxu2 %vm942_vm9, %v5893_v35 }
 0x216   : > { %4609 = vmatmul.msk.f32.vlgmr.msrb.gmra.mxu3 %vm942_vm9, %v5893_v35  ;;  %3719 = vmatpush.msrb.mxu0 %v3594_v60  ;;  %v4852_v35 = vunpack.i.h.bf16 %v4850_v25  ;;  %v1385_v25 = vadd.f32 %v5838_v7, %v5756_v9  ;;  %v6026_v9 = vpop.permute.xlu1 %4874  ;;  %v1445_v60 = vadd.f32 %v5856_v29, %v5776_v27 }
 0x217   : > { %3739 = vmatpush.msrb.mxu1 %v3595_v58  ;;  %3759 = vmatpush.msrb.mxu2 %v3596_v53  ;;  %v3603_v58 = vsel %vm909_vm8, %v3583_v18, %v4862_v26  ;;  %v3604_v53 = vsel %vm909_vm8, %v4862_v26, %v4866_v39  ;;  %v4877_v27 = vunpack.i.h.bf16 %v6026_v9 }
 0x218   : > { %3779 = vmatpush.msrb.mxu3 %v3597_v19  ;;  %v1955_v0 = vpop.f32.mrf.mxu2  ;;  %v3599_v56 = vsel %vm909_vm8, %v4861_v34, %v4852_v35  ;;  %v3600_v16 = vsel %vm909_vm8, %v4852_v35, %v4856_v15  ;;  %v1465_v19 = vadd.f32 %v5858_v17, %v5778_v21  ;;  %v4871_v21 = vunpack.i.l.bf16 %v6002_v32 }
 0x219   : > { %v5991_v4 = vadd.f32 %v1955_v0, %v5889_v6  ;;  %v1975_v5 = vpop.f32.mrf.mxu3  ;;  %v5993_v10 = vpop.f32.mrf.mxu0  ;;  %v3598_v6 = vsel %vm909_vm8, %v4847_v48, %v4861_v34  ;;  %v1986_v0 = vadd.f32 %v5942_v55, %v1445_v60 }
 0x21a   : > { %v5996_v2 = vadd.f32 %v1975_v5, %v5896_v8  ;;  %v5998_v12 = vpop.f32.mrf.mxu1  ;;  %v1365_v8 = vadd.f32 %v5836_v51, %v5754_v61  ;;  %v4867_v61 = vunpack.i.h.bf16 %v4865_v57  ;;  %v1983_v51 = vadd.f32 %v5921_v1, %v1385_v25  ;;  %v6045_v42 = vpop.permute.xlu0 %4879 }
 0x21b   : > { %v4872_v57 = vunpack.i.h.bf16 %v6002_v32  ;;  %v4881_v29 = vunpack.i.l.bf16 %v6045_v42  ;;  %v1987_v5 = vadd.f32 %v5946_v59, %v1465_v19  ;;  %v1525_v32 = vadd.f32 %v5872_v3, %v5796_v30 }
 0x21c   : > { %4610 = vmatmul.msk.f32.vlgmr.msra.gmra.mxu0 %vm942_vm9, %v5923_v22  ;;  %v1982_v14 = vadd.f32 %v5917_v50, %v1365_v8  ;;  %v3605_v1 = vsel %vm909_vm8, %v4866_v39, %v4867_v61  ;;  %v4876_v8 = vunpack.i.l.bf16 %v6026_v9  ;;  %v4882_v26 = vunpack.i.h.bf16 %v6045_v42 }
 0x21d   : > { %4611 = vmatmul.msk.f32.vlgmr.msra.gmra.mxu1 %vm942_vm9, %v5923_v22  ;;  %4612 = vmatmul.msk.f32.vlgmr.msra.gmra.mxu2 %vm942_vm9, %v5923_v22  ;;  %v3998_v25 = vsel %vm1623_vm10, %v4871_v21, %v4872_v57  ;;  %v1990_v61 = vadd.f32 %v5966_v28, %v1525_v32 }
 0x21e   : > { %4613 = vmatmul.msk.f32.vlgmr.msra.gmra.mxu3 %vm942_vm9, %v5923_v22  ;;  %3799 = vmatpush.msra.mxu0 %v3598_v6  ;;  %v4366_v6 = vld [vmem:[%s6327_s3] sm:$0xff] }
 0x21f   : > { %3819 = vmatpush.msra.mxu1 %v3599_v56  ;;  %3839 = vmatpush.msra.mxu2 %v3600_v16  ;;  %v6075_v56 = vpop.permute.xlu1 %4884  ;;  %v3997_v16 = vsel %vm1623_vm10, %v4881_v29, %v4871_v21 }
 0x220   : > { %3859 = vmatpush.msra.mxu3 %v3601_v62  ;;  %v2055_v24 = vpop.f32.mrf.mxu2  ;;  %v1545_v62 = vadd.f32 %v5877_v31, %v5798_v36  ;;  %v4886_v36 = vunpack.i.l.bf16 %v6075_v56 }
 0x221   : > { %v6023_v11 = vadd.f32 %v2055_v24, %v5915_v49  ;;  %v2075_v38 = vpop.f32.mrf.mxu3  ;;  %v2095_v23 = vpop.f32.mrf.mxu0  ;;  %v3602_v49 = vsel %vm909_vm8, %v4857_v40, %v3583_v18 }
 0x222   : > { %v6029_v7 = vadd.f32 %v2075_v38, %v5919_v52  ;;  %v6031_v48 = vadd.f32 %v2095_v23, %v1982_v14  ;;  %v2115_v50 = vpop.f32.mrf.mxu1  ;;  %v6043_v52 = vpop.permute.xlu2 %3960  ;;  %v3999_v14 = vsel %vm1623_vm10, %v4872_v57, %v4876_v8  ;;  %v1991_v3 = vadd.f32 %v5974_v13, %v1545_v62 }
 0x223   : > { %v6033_v63 = vadd.f32 %v2115_v50, %v1983_v51  ;;  %v4887_v50 = vunpack.i.h.bf16 %v6075_v56  ;;  %v1305_v13 = vadd.f32 %v5818_v54, %v5736_v47  ;;  %v4895_v47 = vpop.permute.xlu0 %4894 }
 0x224   : > { %4614 = vmatmul.msk.f32.vlgmr.msrb.gmra.mxu0 %vm942_vm9, %v5923_v22 }
 0x225   : > { %4615 = vmatmul.msk.f32.vlgmr.msrb.gmra.mxu1 %vm942_vm9, %v5923_v22  ;;  %4616 = vmatmul.msk.f32.vlgmr.msrb.gmra.mxu2 %vm942_vm9, %v5923_v22  ;;  %v1979_v54 = vadd.f32 %v5898_v41, %v1305_v13  ;;  %v4003_v60 = vsel %vm1623_vm10, %v4886_v36, %v4887_v50 }
 0x226   : > { %4617 = vmatmul.msk.f32.vlgmr.msrb.gmra.mxu3 %vm942_vm9, %v5923_v22  ;;  %3879 = vmatpush.msrb.mxu0 %v3602_v49 }
 0x227   : > { %3899 = vmatpush.msrb.mxu1 %v3603_v58  ;;  %3919 = vmatpush.msrb.mxu2 %v3604_v53  ;;  %v2319_v19 = vadd.f32 %v5998_v12, %v1979_v54 }
 0x228   : > { %v2135_v34 = vpop.f32.mrf.mxu2  ;;  %3939 = vmatpush.msrb.mxu3 %v3605_v1  ;;  %v4900_v1 = vpop.permute.xlu1 %4899 }
 0x229   : > { %v6061_v35 = vadd.f32 %v2135_v34, %v5940_v20  ;;  %v2155_v40 = vpop.f32.mrf.mxu3  ;;  %v2175_v15 = vpop.f32.mrf.mxu0  ;;  %v4943_v20 = vmov 0   ;;  %v4896_v34 = vunpack.i.l.bf16 %v4895_v47 }
 0x22a   : > { %v6065_v17 = vadd.f32 %v2155_v40, %v5944_v44  ;;  %v6067_v18 = vadd.f32 %v2175_v15, %v1986_v0  ;;  %v2195_v55 = vpop.f32.mrf.mxu1  ;;  %4908 = vset.pattern.permute.xlu1 %v4943_v20  ;;  %4909 = vset.pattern.permute.xlu0 %v4943_v20  ;;  %v3996_v44 = vsel %vm1623_vm10, %v4877_v27, %v4881_v29  ;;  %v4890_v24 = vpop.permute.xlu2 %4889 }
 0x22b   : > { %v6073_v59 = vadd.f32 %v2195_v55, %v1987_v5  ;;  %4369 = vperm.xlu1 %4908, %v4366_v6   ;;  %v4891_v28 = vunpack.i.l.bf16 %v4890_v24  ;;  %v4897_v5 = vunpack.i.h.bf16 %v4895_v47 }
 0x22c   : > { %4618 = vmatmul.msk.f32.vlgmr.msra.gmra.mxu0 %vm942_vm9, %v5923_v22 }
 0x22d   : > { %4619 = vmatmul.msk.f32.vlgmr.msra.gmra.mxu1 %vm942_vm9, %v5923_v22  ;;  %4620 = vmatmul.msk.f32.vlgmr.msra.gmra.mxu2 %vm942_vm9, %v5923_v22  ;;  %v4007_v21 = vsel %vm1623_vm10, %v4896_v34, %v4897_v5 }
 0x22e   : > { %4621 = vmatmul.msk.f32.vlgmr.msra.gmra.mxu3 %vm942_vm9, %v5923_v22  ;;  %4045 = vmatpush.msra.mxu0 %v3996_v44  ;;  %v4902_v44 = vunpack.i.h.bf16 %v4900_v1 }
 0x22f   : > { %4065 = vmatpush.msra.mxu1 %v3997_v16  ;;  %4085 = vmatpush.msra.mxu2 %v3998_v25  ;;  %v3989_v16 = vpop.permute.xlu0 %3988 }
 0x230   : > { %4105 = vmatpush.msra.mxu3 %v3999_v14  ;;  %v2215_v30 = vpop.f32.mrf.mxu2 }
 0x231   : > { %v6096_v51 = vadd.f32 %v2215_v30, %v5964_v37  ;;  %v2235_v38 = vpop.f32.mrf.mxu3  ;;  %v2255_v23 = vpop.f32.mrf.mxu0  ;;  %v1285_v37 = vadd.f32 %v5816_v46, %v5733_v45  ;;  %v4001_v45 = vsel %vm1623_vm10, %v4891_v28, %v4882_v26  ;;  %v4002_v46 = vsel %vm1623_vm10, %v4882_v26, %v4886_v36 }
 0x232   : > { %v6101_v31 = vadd.f32 %v2235_v38, %v5972_v43  ;;  %v6103_v39 = vadd.f32 %v2255_v23, %v1990_v61  ;;  %v2275_v9 = vpop.f32.mrf.mxu1  ;;  %v4000_v43 = vsel %vm1623_vm10, %v4876_v8, %v4891_v28  ;;  %v4905_v15 = vpop.permute.xlu2 %4904  ;;  %v4008_v61 = vsel %vm1623_vm10, %v4897_v5, %v3989_v16 }
 0x233   : > { %v6106_v49 = vadd.f32 %v2275_v9, %v1991_v3  ;;  %v1978_v42 = vadd.f32 %v5891_v33, %v1285_v37  ;;  %v4901_v33 = vunpack.i.l.bf16 %v4900_v1  ;;  %v4907_v6 = vunpack.i.h.bf16 %v4905_v15 }
 0x234   : > { %4622 = vmatmul.msk.f32.vlgmr.msrb.gmra.mxu0 %vm942_vm9, %v5923_v22  ;;  %v4906_v32 = vunpack.i.l.bf16 %v4905_v15 }
 0x235   : > { %4623 = vmatmul.msk.f32.vlgmr.msrb.gmra.mxu1 %vm942_vm9, %v5923_v22  ;;  %4624 = vmatmul.msk.f32.vlgmr.msrb.gmra.mxu2 %vm942_vm9, %v5923_v22  ;;  %v2318_v58 = vadd.f32 %v5993_v10, %v1978_v42  ;;  %v4892_v10 = vunpack.i.h.bf16 %v4890_v24 }
 0x236   : > { %4625 = vmatmul.msk.f32.vlgmr.msrb.gmra.mxu3 %vm942_vm9, %v5923_v22  ;;  %4125 = vmatpush.msrb.mxu0 %v4000_v43 }
 0x237   : > { %4145 = vmatpush.msrb.mxu1 %v4001_v45  ;;  %4165 = vmatpush.msrb.mxu2 %v4002_v46  ;;  %v4006_v12 = vsel %vm1623_vm10, %v4892_v10, %v4896_v34 }
 0x238   : > { %4185 = vmatpush.msrb.mxu3 %v4003_v60  ;;  %v2295_v53 = vpop.f32.mrf.mxu2 }
 0x239   : > { %v6129_v22 = vadd.f32 %v2295_v53, %v5991_v4  ;;  %v2315_v57 = vpop.f32.mrf.mxu3  ;;  %v2455_v0 = vpop.f32.mrf.mxu0  ;;  %v4004_v4 = vsel %vm1623_vm10, %v4887_v50, %v4901_v33 }
 0x23a   : > { %v6132_v27 = vadd.f32 %v2315_v57, %v5996_v2  ;;  %v6134_v41 = vadd.f32 %v2455_v0, %v2318_v58  ;;  %v2475_v29 = vpop.f32.mrf.mxu1  ;;  %v4005_v2 = vsel %vm1623_vm10, %v4901_v33, %v4892_v10 }
 0x23b   : > { %v6136_v40 = vadd.f32 %v2475_v29, %v2319_v19 }
 0x23c   : > { %4626 = vmatmul.msk.f32.vlgmr.msra.gmra.mxu0 %vm942_vm9, %v6043_v52 }
 0x23d   : > { %4627 = vmatmul.msk.f32.vlgmr.msra.gmra.mxu1 %vm942_vm9, %v6043_v52  ;;  %4628 = vmatmul.msk.f32.vlgmr.msra.gmra.mxu2 %vm942_vm9, %v6043_v52 }
 0x23e   : > { %4629 = vmatmul.msk.f32.vlgmr.msra.gmra.mxu3 %vm942_vm9, %v6043_v52  ;;  %4205 = vmatpush.msra.mxu0 %v4004_v4 }
 0x23f   : > { %4225 = vmatpush.msra.mxu1 %v4005_v2  ;;  %4245 = vmatpush.msra.mxu2 %v4006_v12 }
 0x240   : > { %4265 = vmatpush.msra.mxu3 %v4007_v21  ;;  %v2495_v55 = vpop.f32.mrf.mxu2 }
 0x241   : > { %v2760_v8 = vadd.f32 %v2495_v55, %v6023_v11  ;;  %v2515_v20 = vpop.f32.mrf.mxu3  ;;  %v2535_v56 = vpop.f32.mrf.mxu0  ;;  %v4011_v11 = vsel %vm1623_vm10, %v4906_v32, %v4907_v6 }
 0x242   : > { %v2761_v25 = vadd.f32 %v2515_v20, %v6029_v7  ;;  %v2762_v62 = vadd.f32 %v2535_v56, %v6031_v48  ;;  %v2555_v14 = vpop.f32.mrf.mxu1  ;;  %v4009_v7 = vsel %vm1623_vm10, %v3989_v16, %v4902_v44  ;;  %v4010_v48 = vsel %vm1623_vm10, %v4902_v44, %v4906_v32 }
 0x243   : > { %v2763_v24 = vadd.f32 %v2555_v14, %v6033_v63 }
 0x244   : > { %4630 = vmatmul.msk.f32.vlgmr.msrb.gmra.mxu0 %vm942_vm9, %v6043_v52 }
 0x245   : > { %4631 = vmatmul.msk.f32.vlgmr.msrb.gmra.mxu1 %vm942_vm9, %v6043_v52  ;;  %4632 = vmatmul.msk.f32.vlgmr.msrb.gmra.mxu2 %vm942_vm9, %v6043_v52 }
 0x246   : > { %4633 = vmatmul.msk.f32.vlgmr.msrb.gmra.mxu3 %vm942_vm9, %v6043_v52  ;;  %4285 = vmatpush.msrb.mxu0 %v4008_v61 }
 0x247   : > { %4305 = vmatpush.msrb.mxu1 %v4009_v7  ;;  %4325 = vmatpush.msrb.mxu2 %v4010_v48 }
 0x248   : > { %v2575_v63 = vpop.f32.mrf.mxu2  ;;  %4345 = vmatpush.msrb.mxu3 %v4011_v11 }
 0x249   : > { %v2764_v30 = vadd.f32 %v2575_v63, %v6061_v35  ;;  %v2595_v3 = vpop.f32.mrf.mxu3  ;;  %v2615_v38 = vpop.f32.mrf.mxu0 }
 0x24a   : > { %v2765_v23 = vadd.f32 %v2595_v3, %v6065_v17  ;;  %v2766_v26 = vadd.f32 %v2615_v38, %v6067_v18  ;;  %v2635_v36 = vpop.f32.mrf.mxu1 }
 0x24b   : > { %v2767_v9 = vadd.f32 %v2635_v36, %v6073_v59 }
 0x24c   : > { %4634 = vmatmul.msk.f32.vlgmr.msra.gmra.mxu0 %vm942_vm9, %v6043_v52 }
 0x24d   : > { %4635 = vmatmul.msk.f32.vlgmr.msra.gmra.mxu1 %vm942_vm9, %v6043_v52  ;;  %4636 = vmatmul.msk.f32.vlgmr.msra.gmra.mxu2 %vm942_vm9, %v6043_v52 }
 0x24e   : > { %4637 = vmatmul.msk.f32.vlgmr.msra.gmra.mxu3 %vm942_vm9, %v6043_v52 }
 0x250   : > { %v2655_v35 = vpop.f32.mrf.mxu2 }
 0x251   : > { %v2768_v17 = vadd.f32 %v2655_v35, %v6096_v51  ;;  %v2675_v28 = vpop.f32.mrf.mxu3  ;;  %v2695_v18 = vpop.f32.mrf.mxu0 }
 0x252   : > { %v2769_v50 = vadd.f32 %v2675_v28, %v6101_v31  ;;  %v2770_v59 = vadd.f32 %v2695_v18, %v6103_v39  ;;  %v2715_v37 = vpop.f32.mrf.mxu1 }
 0x253   : > { %v2771_v13 = vadd.f32 %v2715_v37, %v6106_v49 }
 0x254   : > { %4638 = vmatmul.msk.f32.vlgmr.msrb.gmra.mxu0 %vm942_vm9, %v6043_v52 }
 0x255   : > { %4639 = vmatmul.msk.f32.vlgmr.msrb.gmra.mxu1 %vm942_vm9, %v6043_v52  ;;  %4640 = vmatmul.msk.f32.vlgmr.msrb.gmra.mxu2 %vm942_vm9, %v6043_v52 }
 0x256   : > { %4641 = vmatmul.msk.f32.vlgmr.msrb.gmra.mxu3 %vm942_vm9, %v6043_v52 }
 0x258   : > { %v2735_v51 = vpop.f32.mrf.mxu2 }
 0x259   : > { %v2772_v31 = vadd.f32 %v2735_v51, %v6129_v22  ;;  %v2755_v43 = vpop.f32.mrf.mxu3  ;;  %v2861_v39 = vpop.f32.mrf.mxu0 }
 0x25a   : > { %v2773_v1 = vadd.f32 %v2755_v43, %v6132_v27  ;;  %v3164_v49 = vadd.f32 %v2861_v39, %v6134_v41  ;;  %v2881_v42 = vpop.f32.mrf.mxu1 }
 0x25b   : > { %v3165_v45 = vadd.f32 %v2881_v42, %v6136_v40 }
 0x260   : > { %v2901_v46 = vpop.f32.mrf.mxu2 }
 0x261   : > { %v6194_v47 = vadd.f32 %v2901_v46, %v2760_v8  ;;  %v2921_v54 = vpop.f32.mrf.mxu3  ;;  %v2941_v60 = vpop.f32.mrf.mxu0 }
 0x262   : > { %v6196_v58 = vadd.f32 %v2921_v54, %v2761_v25  ;;  %v6198_v52 = vadd.f32 %v2941_v60, %v2762_v62  ;;  %v2961_v53 = vpop.f32.mrf.mxu1 }
 0x263   : > { %v6200_v33 = vadd.f32 %v2961_v53, %v2763_v24 }
 0x268   : > { %v2981_v19 = vpop.f32.mrf.mxu2 }
 0x269   : > { %v6202_v22 = vadd.f32 %v2981_v19, %v2764_v30  ;;  %v3001_v57 = vpop.f32.mrf.mxu3  ;;  %v3021_v0 = vpop.f32.mrf.mxu0 }
 0x26a   : > { %v6204_v34 = vadd.f32 %v3001_v57, %v2765_v23  ;;  %v6206_v27 = vadd.f32 %v3021_v0, %v2766_v26  ;;  %v3041_v41 = vpop.f32.mrf.mxu1 }
 0x26b   : > { %v6208_v29 = vadd.f32 %v3041_v41, %v2767_v9 }
 0x270   : > { %v3061_v5 = vpop.f32.mrf.mxu2 }
 0x271   : > { %v6210_v40 = vadd.f32 %v3061_v5, %v2768_v17  ;;  %v3081_v10 = vpop.f32.mrf.mxu3  ;;  %v3101_v4 = vpop.f32.mrf.mxu0 }
 0x272   : > { %v6212_v2 = vadd.f32 %v3081_v10, %v2769_v50  ;;  %v6214_v12 = vadd.f32 %v3101_v4, %v2770_v59  ;;  %v3121_v15 = vpop.f32.mrf.mxu1 }
 0x273   : > { %v6216_v21 = vadd.f32 %v3121_v15, %v2771_v13 }
 0x278   : > { %v3141_v55 = vpop.f32.mrf.mxu2 }
 0x279   : > { %v6218_v6 = vadd.f32 %v3141_v55, %v2772_v31  ;;  %v3161_v8 = vpop.f32.mrf.mxu3  ;;  %v3201_v20 = vpop.f32.mrf.mxu0 }
 0x27a   : > { %v6220_v56 = vadd.f32 %v3161_v8, %v2773_v1  ;;  %v3221_v44 = vpop.f32.mrf.mxu1  ;;  %v3504_v43 = vadd.f32 %v3201_v20, %v3164_v49 }
 0x27b   : > { %v3505_v39 = vadd.f32 %v3221_v44, %v3165_v45 }
 0x280   : > { %v3241_v32 = vpop.f32.mrf.mxu2 }
 0x281   : > { %v3261_v16 = vpop.f32.mrf.mxu3  ;;  %v3281_v25 = vpop.f32.mrf.mxu0  ;;  %v3506_v5 = vadd.f32 %v3241_v32, %v6194_v47 }
 0x282   : > { %v3301_v62 = vpop.f32.mrf.mxu1  ;;  %v3507_v45 = vadd.f32 %v3261_v16, %v6196_v58  ;;  %v3508_v10 = vadd.f32 %v3281_v25, %v6198_v52 }
 0x283   : > { %v3509_v15 = vadd.f32 %v3301_v62, %v6200_v33 }
 0x288   : > { %v3321_v14 = vpop.f32.mrf.mxu2 }
 0x289   : > { %v6222_v24 = vpop.f32.mrf.mxu3  ;;  %v6224_v61 = vpop.f32.mrf.mxu0  ;;  %v3510_v62 = vadd.f32 %v3321_v14, %v6202_v22 }
 0x28a   : > { %v6226_v11 = vpop.f32.mrf.mxu1 }
 0x290   : > { %v6228_v7 = vpop.f32.mrf.mxu2 }
 0x291   : > { %v6230_v48 = vpop.f32.mrf.mxu3  ;;  %v6232_v63 = vpop.f32.mrf.mxu0 }
 0x292   : > { %v6234_v30 = vpop.f32.mrf.mxu1 }
 0x298   : > { %v6236_v3 = vpop.f32.mrf.mxu2 }
 0x299   : > { %v6238_v38 = vpop.f32.mrf.mxu3  ;;  %v3641_v23 = vpop.f32.mrf.mxu0 }
 0x29a   : > { %v3661_v26 = vpop.f32.mrf.mxu1  ;;  %v3944_v1 = vadd.f32 %v3641_v23, %v3504_v43 }
 0x29b   : > { %v3945_v54 = vadd.f32 %v3661_v26, %v3505_v39 }
 0x29d   : > { %v6250_v46 = vpop.permute.xlu1 %4369 }
 0x2a0   : > { %v3681_v36 = vpop.f32.mrf.mxu2 }
 0x2a1   : > { %v3701_v9 = vpop.f32.mrf.mxu3  ;;  %v3721_v35 = vpop.f32.mrf.mxu0  ;;  %v3946_v55 = vadd.f32 %v3681_v36, %v3506_v5 }
 0x2a2   : > { %v3741_v17 = vpop.f32.mrf.mxu1  ;;  %v3947_v20 = vadd.f32 %v3701_v9, %v3507_v45  ;;  %v3948_v47 = vadd.f32 %v3721_v35, %v3508_v10  ;;  %v3511_v35 = vadd.f32 %v6222_v24, %v6204_v34 }
 0x2a3   : > { %v3949_v32 = vadd.f32 %v3741_v17, %v3509_v15  ;;  %v3512_v17 = vadd.f32 %v6224_v61, %v6206_v27  ;;  %v3516_v15 = vadd.f32 %v6232_v63, %v6214_v12 }
 0x2a8   : > { %v3761_v28 = vpop.f32.mrf.mxu2 }
 0x2a9   : > { %v3781_v18 = vpop.f32.mrf.mxu3  ;;  %v3801_v50 = vpop.f32.mrf.mxu0 }
 0x2aa   : > { %v3821_v59 = vpop.f32.mrf.mxu1  ;;  %v3951_v22 = vadd.f32 %v3781_v18, %v3511_v35  ;;  %v3952_v14 = vadd.f32 %v3801_v50, %v3512_v17  ;;  %v3514_v18 = vadd.f32 %v6228_v7, %v6210_v40 }
 0x2b0   : > { %v6240_v37 = vpop.f32.mrf.mxu2 }
 0x2b1   : > { %v6242_v13 = vpop.f32.mrf.mxu3  ;;  %v6244_v51 = vpop.f32.mrf.mxu0 }
 0x2b2   : > { %v6246_v31 = vpop.f32.mrf.mxu1 }
 0x2b8   : > { %v6248_v42 = vpop.f32.mrf.mxu2 }
 0x2b9   : > { %v6252_v60 = vpop.f32.mrf.mxu3  ;;  %v4047_v53 = vpop.f32.mrf.mxu0 }
 0x2ba   : > { %v4350_v19 = vadd.f32 %v4047_v53, %v3944_v1  ;;  %v4067_v57 = vpop.f32.mrf.mxu1 }
 0x2bb   : > { %v4351_v0 = vadd.f32 %v4067_v57, %v3945_v54  ;;  %v3950_v57 = vadd.f32 %v3761_v28, %v3510_v62 }
 0x2bc   : > { %v4372_v41 = vadd.f32 %v6250_v46, %v4350_v19  ;;  %v3513_v19 = vadd.f32 %v6226_v11, %v6208_v29 }
 0x2bd   : > { %v4373_v49 = vadd.f32 %v6250_v46, %v4351_v0 }
 0x2be   : > { %v4388_v4 = vmax.f32 %v4372_v41, 0.0  ;;  %v3953_v5 = vadd.f32 %v3821_v59, %v3513_v19 }
 0x2bf   : > { %v4389_v8 = vmax.f32 %v4373_v49, 0.0 }
 0x2c0   : > { %4404 = vst [vmem:[%s6260_s18] sm:$0xff] %v4388_v4  ;;  %v4087_v44 = vpop.f32.mrf.mxu2  ;;  %v3515_v4 = vadd.f32 %v6230_v48, %v6212_v2 }
 0x2c1   : > { %4405 = vst [vmem:[%s6260_s18 + $0x8] sm:$0xff] %v4389_v8  ;;  %v4352_v23 = vadd.f32 %v4087_v44, %v3946_v55  ;;  %v4107_v26 = vpop.f32.mrf.mxu3  ;;  %v4127_v43 = vpop.f32.mrf.mxu0  ;;  %v3956_v44 = vadd.f32 %v6244_v51, %v3516_v15 }
 0x2c2   : > { %v4353_v39 = vadd.f32 %v4107_v26, %v3947_v20  ;;  %v4354_v1 = vadd.f32 %v4127_v43, %v3948_v47  ;;  %v4147_v58 = vpop.f32.mrf.mxu1  ;;  %v3517_v20 = vadd.f32 %v6234_v30, %v6216_v21  ;;  %v3954_v47 = vadd.f32 %v6240_v37, %v3514_v18 }
 0x2c3   : > { %v4374_v52 = vadd.f32 %v6250_v46, %v4352_v23  ;;  %v4355_v16 = vadd.f32 %v4147_v58, %v3949_v32  ;;  %v3955_v7 = vadd.f32 %v6242_v13, %v3515_v4 }
 0x2c4   : > { %v4375_v33 = vadd.f32 %v6250_v46, %v4353_v39  ;;  %v4376_v25 = vadd.f32 %v6250_v46, %v4354_v1  ;;  %v3957_v2 = vadd.f32 %v6246_v31, %v3517_v20  ;;  %v3518_v31 = vadd.f32 %v6236_v3, %v6218_v6 }
 0x2c5   : > { %v4390_v36 = vmax.f32 %v4374_v52, 0.0  ;;  %v4377_v9 = vadd.f32 %v6250_v46, %v4355_v16  ;;  %v3519_v1 = vadd.f32 %v6238_v38, %v6220_v56 }
 0x2c6   : > { %v4391_v54 = vmax.f32 %v4375_v33, 0.0  ;;  %v4392_v53 = vmax.f32 %v4376_v25, 0.0  ;;  %v3958_v16 = vadd.f32 %v6248_v42, %v3518_v31 }
 0x2c7   : > { %4406 = vst [vmem:[%s6260_s18 + $0x10] sm:$0xff] %v4390_v36  ;;  %v4393_v0 = vmax.f32 %v4377_v9, 0.0  ;;  %v3959_v25 = vadd.f32 %v6252_v60, %v3519_v1 }
 0x2c8   : > { %4407 = vst [vmem:[%s6260_s18 + $0x18] sm:$0xff] %v4391_v54  ;;  %v4167_v41 = vpop.f32.mrf.mxu2 }
 0x2c9   : > { %4408 = vst [vmem:[%s6260_s18 + $0x20] sm:$0xff] %v4392_v53  ;;  %v4356_v49 = vadd.f32 %v4167_v41, %v3950_v57  ;;  %v4187_v34 = vpop.f32.mrf.mxu3  ;;  %v4207_v24 = vpop.f32.mrf.mxu0 }
 0x2ca   : > { %4409 = vst [vmem:[%s6260_s18 + $0x28] sm:$0xff] %v4393_v0  ;;  %v4357_v27 = vadd.f32 %v4187_v34, %v3951_v22  ;;  %v4358_v61 = vadd.f32 %v4207_v24, %v3952_v14  ;;  %v4227_v45 = vpop.f32.mrf.mxu1 }
 0x2cb   : > { %v4378_v10 = vadd.f32 %v6250_v46, %v4356_v49  ;;  %v4359_v29 = vadd.f32 %v4227_v45, %v3953_v5 }
 0x2cc   : > { %v4379_v11 = vadd.f32 %v6250_v46, %v4357_v27  ;;  %v4380_v28 = vadd.f32 %v6250_v46, %v4358_v61 }
 0x2cd   : > { %v4394_v50 = vmax.f32 %v4378_v10, 0.0  ;;  %v4381_v59 = vadd.f32 %v6250_v46, %v4359_v29 }
 0x2ce   : > { %v4395_v55 = vmax.f32 %v4379_v11, 0.0  ;;  %v4396_v8 = vmax.f32 %v4380_v28, 0.0 }
 0x2cf   : > { %4410 = vst [vmem:[%s6260_s18 + $0x30] sm:$0xff] %v4394_v50  ;;  %v4397_v40 = vmax.f32 %v4381_v59, 0.0 }
 0x2d0   : > { %4411 = vst [vmem:[%s6260_s18 + $0x38] sm:$0xff] %v4395_v55  ;;  %v4247_v32 = vpop.f32.mrf.mxu2 }
 0x2d1   : > { %4412 = vst [vmem:[%s6260_s18 + $0x40] sm:$0xff] %v4396_v8  ;;  %v4360_v12 = vadd.f32 %v4247_v32, %v3954_v47  ;;  %v4267_v48 = vpop.f32.mrf.mxu3  ;;  %v4287_v63 = vpop.f32.mrf.mxu0 }
 0x2d2   : > { %4413 = vst [vmem:[%s6260_s18 + $0x48] sm:$0xff] %v4397_v40  ;;  %v4361_v23 = vadd.f32 %v4267_v48, %v3955_v7  ;;  %v4362_v21 = vadd.f32 %v4287_v63, %v3956_v44  ;;  %v4307_v30 = vpop.f32.mrf.mxu1 }
 0x2d3   : > { %v4382_v37 = vadd.f32 %v6250_v46, %v4360_v12  ;;  %v4363_v13 = vadd.f32 %v4307_v30, %v3957_v2 }
 0x2d4   : > { %v4383_v51 = vadd.f32 %v6250_v46, %v4361_v23  ;;  %v4384_v26 = vadd.f32 %v6250_v46, %v4362_v21 }
 0x2d5   : > { %v4398_v43 = vmax.f32 %v4382_v37, 0.0  ;;  %v4385_v39 = vadd.f32 %v6250_v46, %v4363_v13 }
 0x2d6   : > { %v4399_v58 = vmax.f32 %v4383_v51, 0.0  ;;  %v4400_v52 = vmax.f32 %v4384_v26, 0.0 }
 0x2d7   : > { %4414 = vst [vmem:[%s6260_s18 + $0x50] sm:$0xff] %v4398_v43  ;;  %v4401_v33 = vmax.f32 %v4385_v39, 0.0 }
 0x2d8   : > { %4415 = vst [vmem:[%s6260_s18 + $0x58] sm:$0xff] %v4399_v58  ;;  %v4327_v62 = vpop.f32.mrf.mxu2 }
 0x2d9   : > { %4416 = vst [vmem:[%s6260_s18 + $0x60] sm:$0xff] %v4400_v52  ;;  %v4364_v6 = vadd.f32 %v4327_v62, %v3958_v16  ;;  %v4347_v3 = vpop.f32.mrf.mxu3 }
 0x2da   : > { %4417 = vst [vmem:[%s6260_s18 + $0x68] sm:$0xff] %v4401_v33  ;;  %v4365_v36 = vadd.f32 %v4347_v3, %v3959_v25 }
 0x2db   : > { %v4386_v9 = vadd.f32 %v6250_v46, %v4364_v6 }
 0x2dc   : > { %v4387_v56 = vadd.f32 %v6250_v46, %v4365_v36 }
 0x2dd   : > { %v4402_v38 = vmax.f32 %v4386_v9, 0.0 }
 0x2de   : > { %v4403_v35 = vmax.f32 %v4387_v56, 0.0 }
 0x2df   : > { %4418 = vst [vmem:[%s6260_s18 + $0x70] sm:$0xff] %v4402_v38 }
 0x2e0   : > { %4419 = vst [vmem:[%s6260_s18 + $0x78] sm:$0xff] %v4403_v35 }
 0x2e1 PF: > { %s14_s15 = sadd.s32 1, %s4929_s15  }
 0x2e2   : > { %p11_p4 = scmp.ge.s32.totalorder %s14_s15, 4  }
 0x2e4   :  { %13 = sbr.rel (!%p11_p4) target bundleno = 1 (0x1), region = 69 }

</bundles_post_ra>
